<compile_context>
chip_gen: v7x
topology: tpu7x:2x2x1
jax: 0.10.0
libtpu: 0.0.40
codegen_flags: <defaults>
</compile_context>

<pallas_src>
import functools

import jax
import jax.numpy as jnp
import numpy as np
from jax import lax
from jax.experimental import pallas as pl
from jax.experimental.pallas import tpu as pltpu

HIDDEN = 64        # self.hidden_dim in the PyTorch module
NUM_LAYERS = 2


def bar_decoder_kernel(seq_len, num_notes,
                       # VMEM inputs
                       z_ref, gumbel_ref,
                       w1e_ref, b1e_ref, w2e_ref, b2e_ref,
                       wih0_ref, whh0_ref, b0_ref,
                       wih1_ref, whh1_ref, b1_ref,
                       w1d_ref, b1d_ref, w2d_ref, b2d_ref,
                       # VMEM outputs
                       logp_ref,       # (seq_len*B, num_notes) f32
                       samples_ref,    # (seq_len*B, 1) int32
                       # VMEM scratch
                       h1_buf):        # (seq_len*B, HIDDEN) f32
    H = HIDDEN
    z = z_ref[...]
    B = z.shape[0]

    # ---- encode: fc_encode_2(relu(fc_encode_1(z))) -------------------------
    enc_h = jnp.maximum(
        jnp.dot(z.astype(jnp.bfloat16), w1e_ref[...],
                preferred_element_type=jnp.float32) + b1e_ref[...], 0.0)
    encoded = jnp.dot(enc_h.astype(jnp.bfloat16), w2e_ref[...],
                      preferred_element_type=jnp.float32) + b2e_ref[...]

    # Layer-0 input GEMM is loop-invariant (same `encoded` fed every tick);
    # b0 = b_ih0 + b_hh0 was fused in the wrapper.
    xw0 = jnp.dot(encoded.astype(jnp.bfloat16), wih0_ref[...],
                  preferred_element_type=jnp.float32) + b0_ref[...]
    b1 = jnp.broadcast_to(b1_ref[...], (B, 4 * H))   # hoisted broadcast

    # ---- fused gate nonlinearity (hoisted per-lane constants) --------------
    # PyTorch gate order i|f|g|o.  sigmoid(x) = 0.5*tanh(0.5*x) + 0.5, so a
    # single tanh over all 4H lanes with a per-lane pre-scale and post-affine
    # covers all four gates in one EUP launch.
    lane = lax.broadcasted_iota(jnp.int32, (B, 4 * H), 1)
    is_g = (lane >= 2 * H) & (lane < 3 * H)
    pre = jnp.where(is_g, 1.0, 0.5).astype(jnp.float32)     # also post scale
    post_c = jnp.where(is_g, 0.0, 0.5).astype(jnp.float32)

    def gate_act(gates):
        t = jnp.tanh(gates * pre)          # one EUP launch over 4H lanes
        act = pre * t + post_c             # i/f/o -> sigmoid, g -> tanh
        return (act[:, 0:H], act[:, H:2 * H],
                act[:, 2 * H:3 * H], act[:, 3 * H:4 * H])

    h0 = jnp.zeros((B, H), jnp.float32)    # init_hidden_and_cell
    c0 = jnp.zeros((B, H), jnp.float32)
    h1 = jnp.zeros((B, H), jnp.float32)
    c1 = jnp.zeros((B, H), jnp.float32)

    # ---- recurrent chain: only the LSTM stays inside the tick loop ---------
    # Weight refs are read at the use site (not pre-hoisted) so the fully
    # unrolled body does not keep the weight matrices live across 8 ticks.
    for t in range(seq_len):
        # layer 0: only the recurrent GEMM is on the per-tick chain
        gates0 = xw0 + jnp.dot(h0.astype(jnp.bfloat16), whh0_ref[...],
                               preferred_element_type=jnp.float32)
        i0, f0, g0, o0 = gate_act(gates0)
        c0 = f0 * c0 + i0 * g0
        h0 = o0 * jnp.tanh(c0)

        # layer 1: two K=64 dots (no per-tick lane concat), fused bias
        gates1 = (jnp.dot(h0.astype(jnp.bfloat16), wih1_ref[...],
                          preferred_element_type=jnp.float32)
                  + jnp.dot(h1.astype(jnp.bfloat16), whh1_ref[...],
                            preferred_element_type=jnp.float32)
                  + b1)
        i1, f1, g1, o1 = gate_act(gates1)
        c1 = f1 * c1 + i1 * g1
        h1 = o1 * jnp.tanh(c1)

        # stash h1; decode/softmax/sampling happen once, after the loop
        h1_buf[pl.ds(t * B, B), :] = h1

    # ---- batched decode + log_softmax + Gumbel-max sampling ---------------
    h_all = h1_buf[...]                                      # (seq_len*B, H)
    dec_h = jnp.maximum(
        jnp.dot(h_all.astype(jnp.bfloat16), w1d_ref[...],
                preferred_element_type=jnp.float32) + b1d_ref[...], 0.0)
    logits = jnp.dot(dec_h.astype(jnp.bfloat16), w2d_ref[...],
                     preferred_element_type=jnp.float32) + b2d_ref[...]

    m = jnp.max(logits, axis=-1, keepdims=True)
    lse = m + jnp.log(jnp.sum(jnp.exp(logits - m), axis=-1, keepdims=True))
    logp = logits - lse
    logp_ref[...] = logp

    # multinomial(softmax(logits)) == Gumbel-max over logp; noise drawn once
    # in the wrapper, row order matching the stacked h1 rows.
    pert = logp + gumbel_ref[...]
    col = lax.broadcasted_iota(jnp.int32, (seq_len * B, num_notes), 1)
    pmax = jnp.max(pert, axis=-1, keepdims=True)
    samples_ref[...] = jnp.max(jnp.where(pert >= pmax, col, -1),
                               axis=-1, keepdims=True)


def my_bar_decoder_forward(params, z, score_tensor, key, *, seq_len, num_notes):
    """params: 16 arrays (PyTorch-equivalent layout, weights pre-transposed)."""
    del score_tensor  # unused by the reference forward's computation
    B = z.shape[0]
    (w1e, b1e, w2e, b2e,
     wih0, whh0, bih0, bhh0,
     wih1, whh1, bih1, bhh1,
     w1d, b1d, w2d, b2d) = params

    # MXU operands in bf16 (f32 accumulation in-kernel); biases stay f32.
    bf = lambda w: w.astype(jnp.bfloat16)
    b0 = bih0 + bhh0                              # (1, 4H) fused layer-0 bias
    b1 = bih1 + bhh1                              # (1, 4H) fused layer-1 bias

    # One lane-dense batched Gumbel draw for all ticks; row t*B + b.
    gumbel = jax.random.gumbel(key, (seq_len * B, num_notes), dtype=jnp.float32)

    kernel = functools.partial(bar_decoder_kernel, seq_len, num_notes)
    vmem = pl.BlockSpec(memory_space=pltpu.MemorySpace.VMEM)
    logp_flat, samples_flat = pl.pallas_call(
        kernel,
        out_shape=(jax.ShapeDtypeStruct((seq_len * B, num_notes), jnp.float32),
                   jax.ShapeDtypeStruct((seq_len * B, 1), jnp.int32)),
        in_specs=[vmem] * 16,
        out_specs=(vmem, vmem),
        scratch_shapes=[pltpu.VMEM((seq_len * B, HIDDEN), jnp.float32)],
    )(z, gumbel,
      bf(w1e), b1e, bf(w2e), b2e,
      bf(wih0), bf(whh0), b0,
      bf(wih1), bf(whh1), b1,
      bf(w1d), b1d, bf(w2d), b2d)

    # Rows are tick-major (t*B + b): cheap wrapper reshape+transpose.
    weights = logp_flat.reshape(seq_len, B, num_notes).transpose(1, 0, 2)
    samples = samples_flat.reshape(seq_len, B).transpose(1, 0)
    return weights, samples


def init_params(key, z_dim, num_notes):
    """Deterministic uniform(-0.05, 0.05) init (same distribution as init_params)."""
    enc_mid = (z_dim + HIDDEN) // 2
    dec_mid = (HIDDEN + num_notes) // 2
    shapes = [
        (z_dim, enc_mid), (1, enc_mid),          # fc_encode_1 (W^T, b)
        (enc_mid, HIDDEN), (1, HIDDEN),          # fc_encode_2
        (HIDDEN, 4 * HIDDEN), (HIDDEN, 4 * HIDDEN), (1, 4 * HIDDEN), (1, 4 * HIDDEN),  # lstm l0
        (HIDDEN, 4 * HIDDEN), (HIDDEN, 4 * HIDDEN), (1, 4 * HIDDEN), (1, 4 * HIDDEN),  # lstm l1
        (HIDDEN, dec_mid), (1, dec_mid),         # fc_decode_1
        (dec_mid, num_notes), (1, num_notes),    # fc_decode_2
    ]
    keys = jax.random.split(key, len(shapes))
    return tuple(
        jax.random.uniform(k, s, jnp.float32, minval=-0.05, maxval=0.05)
        for k, s in zip(keys, shapes))


if __name__ == "__main__":
    B, z_dim, seq_len, num_notes = 2, 16, 8, 32

    root = jax.random.PRNGKey(0)
    kp, kz, ks = jax.random.split(root, 3)
    params = init_params(kp, z_dim, num_notes)

    z = jax.random.normal(kz, (B, z_dim), jnp.float32)
    score_tensor = jnp.zeros((B, seq_len), jnp.float32)   # unused, as in PyTorch forward

    fwd = jax.jit(functools.partial(my_bar_decoder_forward,
                                    seq_len=seq_len, num_notes=num_notes))
    weights, samples = fwd(params, z, score_tensor, ks)
    jax.block_until_ready((weights, samples))

    assert weights.shape == (B, seq_len, num_notes)
    assert weights.dtype == jnp.float32
    assert samples.shape == (B, seq_len)
    assert samples.dtype == jnp.int32
    # log_softmax rows must exponentiate-and-sum to ~1
    row_sums = np.asarray(jnp.sum(jnp.exp(weights), axis=-1))
    assert np.allclose(row_sums, 1.0, atol=1e-4), row_sums
    assert np.all(np.asarray(samples) >= 0) and np.all(np.asarray(samples) < num_notes)

    print("KERNEL_OK")
</pallas_src>

<mosaic_0001>
module attributes {stable_mosaic.version = 11 : i64} {
  func.func @bar_decoder_kernel(%arg0: memref<2x16xf32, #tpu.memory_space<vmem>>, %arg1: memref<16x32xf32, #tpu.memory_space<vmem>>, %arg2: memref<16x40xbf16, #tpu.memory_space<vmem>>, %arg3: memref<1x40xf32, #tpu.memory_space<vmem>>, %arg4: memref<40x64xbf16, #tpu.memory_space<vmem>>, %arg5: memref<1x64xf32, #tpu.memory_space<vmem>>, %arg6: memref<64x256xbf16, #tpu.memory_space<vmem>>, %arg7: memref<64x256xbf16, #tpu.memory_space<vmem>>, %arg8: memref<1x256xf32, #tpu.memory_space<vmem>>, %arg9: memref<64x256xbf16, #tpu.memory_space<vmem>>, %arg10: memref<64x256xbf16, #tpu.memory_space<vmem>>, %arg11: memref<1x256xf32, #tpu.memory_space<vmem>>, %arg12: memref<64x48xbf16, #tpu.memory_space<vmem>>, %arg13: memref<1x48xf32, #tpu.memory_space<vmem>>, %arg14: memref<48x32xbf16, #tpu.memory_space<vmem>>, %arg15: memref<1x32xf32, #tpu.memory_space<vmem>>, %arg16: memref<16x32xf32, #tpu.memory_space<vmem>>, %arg17: memref<16x1xi32, #tpu.memory_space<vmem>>, %arg18: memref<16x64xf32, #tpu.memory_space<vmem>>) attributes {dimension_semantics = [], scalar_prefetch = 0 : i64, scratch_operands = 1 : i64, tpu.core_type = #tpu.core_type<tc>} {
    %c0 = arith.constant 0 : index
    %c0_0 = arith.constant 0 : index
    %0 = vector.load %arg0[%c0, %c0_0] : memref<2x16xf32, #tpu.memory_space<vmem>>, vector<2x16xf32>
    %1 = arith.truncf %0 : vector<2x16xf32> to vector<2x16xbf16>
    %c0_1 = arith.constant 0 : index
    %c0_2 = arith.constant 0 : index
    %2 = vector.load %arg2[%c0_1, %c0_2] : memref<16x40xbf16, #tpu.memory_space<vmem>>, vector<16x40xbf16>
    %cst = arith.constant dense<0.000000e+00> : vector<2x40xf32>
    %3 = tpu.matmul %1, %2, %cst {dimension_numbers = #tpu.dot_dimension_numbers<[1], [0], [0], [1], [0, 0, 1, 1], [], []>} : vector<2x16xbf16>, vector<16x40xbf16>, vector<2x40xf32> -> vector<2x40xf32>
    %c0_3 = arith.constant 0 : index
    %c0_4 = arith.constant 0 : index
    %4 = vector.load %arg3[%c0_3, %c0_4] : memref<1x40xf32, #tpu.memory_space<vmem>>, vector<1x40xf32>
    %5 = vector.broadcast %4 : vector<1x40xf32> to vector<2x40xf32>
    %6 = arith.addf %3, %5 : vector<2x40xf32>
    %cst_5 = arith.constant 0.000000e+00 : f32
    %7 = vector.broadcast %cst_5 : f32 to vector<2x40xf32>
    %8 = arith.maximumf %6, %7 : vector<2x40xf32>
    %9 = arith.truncf %8 : vector<2x40xf32> to vector<2x40xbf16>
    %c0_6 = arith.constant 0 : index
    %c0_7 = arith.constant 0 : index
    %10 = vector.load %arg4[%c0_6, %c0_7] : memref<40x64xbf16, #tpu.memory_space<vmem>>, vector<40x64xbf16>
    %cst_8 = arith.constant dense<0.000000e+00> : vector<2x64xf32>
    %11 = tpu.matmul %9, %10, %cst_8 {dimension_numbers = #tpu.dot_dimension_numbers<[1], [0], [0], [1], [0, 0, 1, 1], [], []>} : vector<2x40xbf16>, vector<40x64xbf16>, vector<2x64xf32> -> vector<2x64xf32>
    %c0_9 = arith.constant 0 : index
    %c0_10 = arith.constant 0 : index
    %12 = vector.load %arg5[%c0_9, %c0_10] : memref<1x64xf32, #tpu.memory_space<vmem>>, vector<1x64xf32>
    %13 = vector.broadcast %12 : vector<1x64xf32> to vector<2x64xf32>
    %14 = arith.addf %11, %13 : vector<2x64xf32>
    %15 = arith.truncf %14 : vector<2x64xf32> to vector<2x64xbf16>
    %c0_11 = arith.constant 0 : index
    %c0_12 = arith.constant 0 : index
    %16 = vector.load %arg6[%c0_11, %c0_12] : memref<64x256xbf16, #tpu.memory_space<vmem>>, vector<64x256xbf16>
    %cst_13 = arith.constant dense<0.000000e+00> : vector<2x256xf32>
    %17 = tpu.matmul %15, %16, %cst_13 {dimension_numbers = #tpu.dot_dimension_numbers<[1], [0], [0], [1], [0, 0, 1, 1], [], []>} : vector<2x64xbf16>, vector<64x256xbf16>, vector<2x256xf32> -> vector<2x256xf32>
    %c0_14 = arith.constant 0 : index
    %c0_15 = arith.constant 0 : index
    %18 = vector.load %arg8[%c0_14, %c0_15] : memref<1x256xf32, #tpu.memory_space<vmem>>, vector<1x256xf32>
    %19 = vector.broadcast %18 : vector<1x256xf32> to vector<2x256xf32>
    %20 = arith.addf %17, %19 : vector<2x256xf32>
    %c0_16 = arith.constant 0 : index
    %c0_17 = arith.constant 0 : index
    %21 = vector.load %arg11[%c0_16, %c0_17] : memref<1x256xf32, #tpu.memory_space<vmem>>, vector<1x256xf32>
    %22 = vector.shape_cast %21 : vector<1x256xf32> to vector<1x256xf32>
    %23 = vector.broadcast %22 : vector<1x256xf32> to vector<2x256xf32>
    %24 = tpu.iota {dimensions = array<i32: 1>} : vector<2x256xi32>
    %c128_i32 = arith.constant 128 : i32
    %25 = vector.broadcast %c128_i32 : i32 to vector<2x256xi32>
    %26 = arith.cmpi sge, %24, %25 : vector<2x256xi32>
    %c192_i32 = arith.constant 192 : i32
    %27 = vector.broadcast %c192_i32 : i32 to vector<2x256xi32>
    %28 = arith.cmpi slt, %24, %27 : vector<2x256xi32>
    %29 = arith.andi %26, %28 : vector<2x256xi1>
    %cst_18 = arith.constant 1.000000e+00 : f32
    %cst_19 = arith.constant 5.000000e-01 : f32
    %30 = vector.broadcast %cst_18 : f32 to vector<2x256xf32>
    %31 = vector.broadcast %cst_19 : f32 to vector<2x256xf32>
    %32 = arith.select %29, %30, %31 : vector<2x256xi1>, vector<2x256xf32>
    %cst_20 = arith.constant 0.000000e+00 : f32
    %cst_21 = arith.constant 5.000000e-01 : f32
    %33 = vector.broadcast %cst_20 : f32 to vector<2x256xf32>
    %34 = vector.broadcast %cst_21 : f32 to vector<2x256xf32>
    %35 = arith.select %29, %33, %34 : vector<2x256xi1>, vector<2x256xf32>
    %cst_22 = arith.constant 0.000000e+00 : f32
    %36 = vector.broadcast %cst_22 : f32 to vector<2x64xf32>
    %cst_23 = arith.constant 0.000000e+00 : f32
    %37 = vector.broadcast %cst_23 : f32 to vector<2x64xf32>
    %cst_24 = arith.constant 0.000000e+00 : f32
    %38 = vector.broadcast %cst_24 : f32 to vector<2x64xf32>
    %cst_25 = arith.constant 0.000000e+00 : f32
    %39 = vector.broadcast %cst_25 : f32 to vector<2x64xf32>
    %40 = arith.truncf %36 : vector<2x64xf32> to vector<2x64xbf16>
    %c0_26 = arith.constant 0 : index
    %c0_27 = arith.constant 0 : index
    %41 = vector.load %arg7[%c0_26, %c0_27] : memref<64x256xbf16, #tpu.memory_space<vmem>>, vector<64x256xbf16>
    %cst_28 = arith.constant dense<0.000000e+00> : vector<2x256xf32>
    %42 = tpu.matmul %40, %41, %cst_28 {dimension_numbers = #tpu.dot_dimension_numbers<[1], [0], [0], [1], [0, 0, 1, 1], [], []>} : vector<2x64xbf16>, vector<64x256xbf16>, vector<2x256xf32> -> vector<2x256xf32>
    %43 = arith.addf %20, %42 : vector<2x256xf32>
    %44 = arith.mulf %43, %32 : vector<2x256xf32>
    %45 = math.tanh %44 : vector<2x256xf32>
    %46 = arith.mulf %32, %45 : vector<2x256xf32>
    %47 = arith.addf %46, %35 : vector<2x256xf32>
    %48 = vector.extract_strided_slice %47 {offsets = [0, 0], sizes = [2, 64], strides = [1, 1]} : vector<2x256xf32> to vector<2x64xf32>
    %49 = vector.extract_strided_slice %47 {offsets = [0, 64], sizes = [2, 64], strides = [1, 1]} : vector<2x256xf32> to vector<2x64xf32>
    %50 = vector.extract_strided_slice %47 {offsets = [0, 128], sizes = [2, 64], strides = [1, 1]} : vector<2x256xf32> to vector<2x64xf32>
    %51 = vector.extract_strided_slice %47 {offsets = [0, 192], sizes = [2, 64], strides = [1, 1]} : vector<2x256xf32> to vector<2x64xf32>
    %52 = arith.mulf %49, %37 : vector<2x64xf32>
    %53 = arith.mulf %48, %50 : vector<2x64xf32>
    %54 = arith.addf %52, %53 : vector<2x64xf32>
    %55 = math.tanh %54 : vector<2x64xf32>
    %56 = arith.mulf %51, %55 : vector<2x64xf32>
    %57 = arith.truncf %56 : vector<2x64xf32> to vector<2x64xbf16>
    %c0_29 = arith.constant 0 : index
    %c0_30 = arith.constant 0 : index
    %58 = vector.load %arg9[%c0_29, %c0_30] : memref<64x256xbf16, #tpu.memory_space<vmem>>, vector<64x256xbf16>
    %cst_31 = arith.constant dense<0.000000e+00> : vector<2x256xf32>
    %59 = tpu.matmul %57, %58, %cst_31 {dimension_numbers = #tpu.dot_dimension_numbers<[1], [0], [0], [1], [0, 0, 1, 1], [], []>} : vector<2x64xbf16>, vector<64x256xbf16>, vector<2x256xf32> -> vector<2x256xf32>
    %60 = arith.truncf %38 : vector<2x64xf32> to vector<2x64xbf16>
    %c0_32 = arith.constant 0 : index
    %c0_33 = arith.constant 0 : index
    %61 = vector.load %arg10[%c0_32, %c0_33] : memref<64x256xbf16, #tpu.memory_space<vmem>>, vector<64x256xbf16>
    %cst_34 = arith.constant dense<0.000000e+00> : vector<2x256xf32>
    %62 = tpu.matmul %60, %61, %cst_34 {dimension_numbers = #tpu.dot_dimension_numbers<[1], [0], [0], [1], [0, 0, 1, 1], [], []>} : vector<2x64xbf16>, vector<64x256xbf16>, vector<2x256xf32> -> vector<2x256xf32>
    %63 = arith.addf %59, %62 : vector<2x256xf32>
    %64 = arith.addf %63, %23 : vector<2x256xf32>
    %65 = arith.mulf %64, %32 : vector<2x256xf32>
    %66 = math.tanh %65 : vector<2x256xf32>
    %67 = arith.mulf %32, %66 : vector<2x256xf32>
    %68 = arith.addf %67, %35 : vector<2x256xf32>
    %69 = vector.extract_strided_slice %68 {offsets = [0, 0], sizes = [2, 64], strides = [1, 1]} : vector<2x256xf32> to vector<2x64xf32>
    %70 = vector.extract_strided_slice %68 {offsets = [0, 64], sizes = [2, 64], strides = [1, 1]} : vector<2x256xf32> to vector<2x64xf32>
    %71 = vector.extract_strided_slice %68 {offsets = [0, 128], sizes = [2, 64], strides = [1, 1]} : vector<2x256xf32> to vector<2x64xf32>
    %72 = vector.extract_strided_slice %68 {offsets = [0, 192], sizes = [2, 64], strides = [1, 1]} : vector<2x256xf32> to vector<2x64xf32>
    %73 = arith.mulf %70, %39 : vector<2x64xf32>
    %74 = arith.mulf %69, %71 : vector<2x64xf32>
    %75 = arith.addf %73, %74 : vector<2x64xf32>
    %76 = math.tanh %75 : vector<2x64xf32>
    %77 = arith.mulf %72, %76 : vector<2x64xf32>
    %c0_35 = arith.constant 0 : index
    %c0_36 = arith.constant 0 : index
    %78 = vector.load %arg18[%c0_35, %c0_36] : memref<16x64xf32, #tpu.memory_space<vmem>>, vector<2x64xf32>
    tpu.vector_store %arg18[%c0_35, %c0_36], %77 {strides = array<i32>} : memref<16x64xf32, #tpu.memory_space<vmem>>, vector<2x64xf32>,
    %79 = arith.truncf %56 : vector<2x64xf32> to vector<2x64xbf16>
    %c0_37 = arith.constant 0 : index
    %c0_38 = arith.constant 0 : index
    %80 = vector.load %arg7[%c0_37, %c0_38] : memref<64x256xbf16, #tpu.memory_space<vmem>>, vector<64x256xbf16>
    %cst_39 = arith.constant dense<0.000000e+00> : vector<2x256xf32>
    %81 = tpu.matmul %79, %80, %cst_39 {dimension_numbers = #tpu.dot_dimension_numbers<[1], [0], [0], [1], [0, 0, 1, 1], [], []>} : vector<2x64xbf16>, vector<64x256xbf16>, vector<2x256xf32> -> vector<2x256xf32>
    %82 = arith.addf %20, %81 : vector<2x256xf32>
    %83 = arith.mulf %82, %32 : vector<2x256xf32>
    %84 = math.tanh %83 : vector<2x256xf32>
    %85 = arith.mulf %32, %84 : vector<2x256xf32>
    %86 = arith.addf %85, %35 : vector<2x256xf32>
    %87 = vector.extract_strided_slice %86 {offsets = [0, 0], sizes = [2, 64], strides = [1, 1]} : vector<2x256xf32> to vector<2x64xf32>
    %88 = vector.extract_strided_slice %86 {offsets = [0, 64], sizes = [2, 64], strides = [1, 1]} : vector<2x256xf32> to vector<2x64xf32>
    %89 = vector.extract_strided_slice %86 {offsets = [0, 128], sizes = [2, 64], strides = [1, 1]} : vector<2x256xf32> to vector<2x64xf32>
    %90 = vector.extract_strided_slice %86 {offsets = [0, 192], sizes = [2, 64], strides = [1, 1]} : vector<2x256xf32> to vector<2x64xf32>
    %91 = arith.mulf %88, %54 : vector<2x64xf32>
    %92 = arith.mulf %87, %89 : vector<2x64xf32>
    %93 = arith.addf %91, %92 : vector<2x64xf32>
    %94 = math.tanh %93 : vector<2x64xf32>
    %95 = arith.mulf %90, %94 : vector<2x64xf32>
    %96 = arith.truncf %95 : vector<2x64xf32> to vector<2x64xbf16>
    %c0_40 = arith.constant 0 : index
    %c0_41 = arith.constant 0 : index
    %97 = vector.load %arg9[%c0_40, %c0_41] : memref<64x256xbf16, #tpu.memory_space<vmem>>, vector<64x256xbf16>
    %cst_42 = arith.constant dense<0.000000e+00> : vector<2x256xf32>
    %98 = tpu.matmul %96, %97, %cst_42 {dimension_numbers = #tpu.dot_dimension_numbers<[1], [0], [0], [1], [0, 0, 1, 1], [], []>} : vector<2x64xbf16>, vector<64x256xbf16>, vector<2x256xf32> -> vector<2x256xf32>
    %99 = arith.truncf %77 : vector<2x64xf32> to vector<2x64xbf16>
    %c0_43 = arith.constant 0 : index
    %c0_44 = arith.constant 0 : index
    %100 = vector.load %arg10[%c0_43, %c0_44] : memref<64x256xbf16, #tpu.memory_space<vmem>>, vector<64x256xbf16>
    %cst_45 = arith.constant dense<0.000000e+00> : vector<2x256xf32>
    %101 = tpu.matmul %99, %100, %cst_45 {dimension_numbers = #tpu.dot_dimension_numbers<[1], [0], [0], [1], [0, 0, 1, 1], [], []>} : vector<2x64xbf16>, vector<64x256xbf16>, vector<2x256xf32> -> vector<2x256xf32>
    %102 = arith.addf %98, %101 : vector<2x256xf32>
    %103 = arith.addf %102, %23 : vector<2x256xf32>
    %104 = arith.mulf %103, %32 : vector<2x256xf32>
    %105 = math.tanh %104 : vector<2x256xf32>
    %106 = arith.mulf %32, %105 : vector<2x256xf32>
    %107 = arith.addf %106, %35 : vector<2x256xf32>
    %108 = vector.extract_strided_slice %107 {offsets = [0, 0], sizes = [2, 64], strides = [1, 1]} : vector<2x256xf32> to vector<2x64xf32>
    %109 = vector.extract_strided_slice %107 {offsets = [0, 64], sizes = [2, 64], strides = [1, 1]} : vector<2x256xf32> to vector<2x64xf32>
    %110 = vector.extract_strided_slice %107 {offsets = [0, 128], sizes = [2, 64], strides = [1, 1]} : vector<2x256xf32> to vector<2x64xf32>
    %111 = vector.extract_strided_slice %107 {offsets = [0, 192], sizes = [2, 64], strides = [1, 1]} : vector<2x256xf32> to vector<2x64xf32>
    %112 = arith.mulf %109, %75 : vector<2x64xf32>
    %113 = arith.mulf %108, %110 : vector<2x64xf32>
    %114 = arith.addf %112, %113 : vector<2x64xf32>
    %115 = math.tanh %114 : vector<2x64xf32>
    %116 = arith.mulf %111, %115 : vector<2x64xf32>
    %c2 = arith.constant 2 : index
    %c0_46 = arith.constant 0 : index
    %117 = vector.load %arg18[%c2, %c0_46] : memref<16x64xf32, #tpu.memory_space<vmem>>, vector<2x64xf32>
    tpu.vector_store %arg18[%c2, %c0_46], %116 {strides = array<i32>} : memref<16x64xf32, #tpu.memory_space<vmem>>, vector<2x64xf32>,
    %118 = arith.truncf %95 : vector<2x64xf32> to vector<2x64xbf16>
    %c0_47 = arith.constant 0 : index
    %c0_48 = arith.constant 0 : index
    %119 = vector.load %arg7[%c0_47, %c0_48] : memref<64x256xbf16, #tpu.memory_space<vmem>>, vector<64x256xbf16>
    %cst_49 = arith.constant dense<0.000000e+00> : vector<2x256xf32>
    %120 = tpu.matmul %118, %119, %cst_49 {dimension_numbers = #tpu.dot_dimension_numbers<[1], [0], [0], [1], [0, 0, 1, 1], [], []>} : vector<2x64xbf16>, vector<64x256xbf16>, vector<2x256xf32> -> vector<2x256xf32>
    %121 = arith.addf %20, %120 : vector<2x256xf32>
    %122 = arith.mulf %121, %32 : vector<2x256xf32>
    %123 = math.tanh %122 : vector<2x256xf32>
    %124 = arith.mulf %32, %123 : vector<2x256xf32>
    %125 = arith.addf %124, %35 : vector<2x256xf32>
    %126 = vector.extract_strided_slice %125 {offsets = [0, 0], sizes = [2, 64], strides = [1, 1]} : vector<2x256xf32> to vector<2x64xf32>
    %127 = vector.extract_strided_slice %125 {offsets = [0, 64], sizes = [2, 64], strides = [1, 1]} : vector<2x256xf32> to vector<2x64xf32>
    %128 = vector.extract_strided_slice %125 {offsets = [0, 128], sizes = [2, 64], strides = [1, 1]} : vector<2x256xf32> to vector<2x64xf32>
    %129 = vector.extract_strided_slice %125 {offsets = [0, 192], sizes = [2, 64], strides = [1, 1]} : vector<2x256xf32> to vector<2x64xf32>
    %130 = arith.mulf %127, %93 : vector<2x64xf32>
    %131 = arith.mulf %126, %128 : vector<2x64xf32>
    %132 = arith.addf %130, %131 : vector<2x64xf32>
    %133 = math.tanh %132 : vector<2x64xf32>
    %134 = arith.mulf %129, %133 : vector<2x64xf32>
    %135 = arith.truncf %134 : vector<2x64xf32> to vector<2x64xbf16>
    %c0_50 = arith.constant 0 : index
    %c0_51 = arith.constant 0 : index
    %136 = vector.load %arg9[%c0_50, %c0_51] : memref<64x256xbf16, #tpu.memory_space<vmem>>, vector<64x256xbf16>
    %cst_52 = arith.constant dense<0.000000e+00> : vector<2x256xf32>
    %137 = tpu.matmul %135, %136, %cst_52 {dimension_numbers = #tpu.dot_dimension_numbers<[1], [0], [0], [1], [0, 0, 1, 1], [], []>} : vector<2x64xbf16>, vector<64x256xbf16>, vector<2x256xf32> -> vector<2x256xf32>
    %138 = arith.truncf %116 : vector<2x64xf32> to vector<2x64xbf16>
    %c0_53 = arith.constant 0 : index
    %c0_54 = arith.constant 0 : index
    %139 = vector.load %arg10[%c0_53, %c0_54] : memref<64x256xbf16, #tpu.memory_space<vmem>>, vector<64x256xbf16>
    %cst_55 = arith.constant dense<0.000000e+00> : vector<2x256xf32>
    %140 = tpu.matmul %138, %139, %cst_55 {dimension_numbers = #tpu.dot_dimension_numbers<[1], [0], [0], [1], [0, 0, 1, 1], [], []>} : vector<2x64xbf16>, vector<64x256xbf16>, vector<2x256xf32> -> vector<2x256xf32>
    %141 = arith.addf %137, %140 : vector<2x256xf32>
    %142 = arith.addf %141, %23 : vector<2x256xf32>
    %143 = arith.mulf %142, %32 : vector<2x256xf32>
    %144 = math.tanh %143 : vector<2x256xf32>
    %145 = arith.mulf %32, %144 : vector<2x256xf32>
    %146 = arith.addf %145, %35 : vector<2x256xf32>
    %147 = vector.extract_strided_slice %146 {offsets = [0, 0], sizes = [2, 64], strides = [1, 1]} : vector<2x256xf32> to vector<2x64xf32>
    %148 = vector.extract_strided_slice %146 {offsets = [0, 64], sizes = [2, 64], strides = [1, 1]} : vector<2x256xf32> to vector<2x64xf32>
    %149 = vector.extract_strided_slice %146 {offsets = [0, 128], sizes = [2, 64], strides = [1, 1]} : vector<2x256xf32> to vector<2x64xf32>
    %150 = vector.extract_strided_slice %146 {offsets = [0, 192], sizes = [2, 64], strides = [1, 1]} : vector<2x256xf32> to vector<2x64xf32>
    %151 = arith.mulf %148, %114 : vector<2x64xf32>
    %152 = arith.mulf %147, %149 : vector<2x64xf32>
    %153 = arith.addf %151, %152 : vector<2x64xf32>
    %154 = math.tanh %153 : vector<2x64xf32>
    %155 = arith.mulf %150, %154 : vector<2x64xf32>
    %c4 = arith.constant 4 : index
    %c0_56 = arith.constant 0 : index
    %156 = vector.load %arg18[%c4, %c0_56] : memref<16x64xf32, #tpu.memory_space<vmem>>, vector<2x64xf32>
    tpu.vector_store %arg18[%c4, %c0_56], %155 {strides = array<i32>} : memref<16x64xf32, #tpu.memory_space<vmem>>, vector<2x64xf32>,
    %157 = arith.truncf %134 : vector<2x64xf32> to vector<2x64xbf16>
    %c0_57 = arith.constant 0 : index
    %c0_58 = arith.constant 0 : index
    %158 = vector.load %arg7[%c0_57, %c0_58] : memref<64x256xbf16, #tpu.memory_space<vmem>>, vector<64x256xbf16>
    %cst_59 = arith.constant dense<0.000000e+00> : vector<2x256xf32>
    %159 = tpu.matmul %157, %158, %cst_59 {dimension_numbers = #tpu.dot_dimension_numbers<[1], [0], [0], [1], [0, 0, 1, 1], [], []>} : vector<2x64xbf16>, vector<64x256xbf16>, vector<2x256xf32> -> vector<2x256xf32>
    %160 = arith.addf %20, %159 : vector<2x256xf32>
    %161 = arith.mulf %160, %32 : vector<2x256xf32>
    %162 = math.tanh %161 : vector<2x256xf32>
    %163 = arith.mulf %32, %162 : vector<2x256xf32>
    %164 = arith.addf %163, %35 : vector<2x256xf32>
    %165 = vector.extract_strided_slice %164 {offsets = [0, 0], sizes = [2, 64], strides = [1, 1]} : vector<2x256xf32> to vector<2x64xf32>
    %166 = vector.extract_strided_slice %164 {offsets = [0, 64], sizes = [2, 64], strides = [1, 1]} : vector<2x256xf32> to vector<2x64xf32>
    %167 = vector.extract_strided_slice %164 {offsets = [0, 128], sizes = [2, 64], strides = [1, 1]} : vector<2x256xf32> to vector<2x64xf32>
    %168 = vector.extract_strided_slice %164 {offsets = [0, 192], sizes = [2, 64], strides = [1, 1]} : vector<2x256xf32> to vector<2x64xf32>
    %169 = arith.mulf %166, %132 : vector<2x64xf32>
    %170 = arith.mulf %165, %167 : vector<2x64xf32>
    %171 = arith.addf %169, %170 : vector<2x64xf32>
    %172 = math.tanh %171 : vector<2x64xf32>
    %173 = arith.mulf %168, %172 : vector<2x64xf32>
    %174 = arith.truncf %173 : vector<2x64xf32> to vector<2x64xbf16>
    %c0_60 = arith.constant 0 : index
    %c0_61 = arith.constant 0 : index
    %175 = vector.load %arg9[%c0_60, %c0_61] : memref<64x256xbf16, #tpu.memory_space<vmem>>, vector<64x256xbf16>
    %cst_62 = arith.constant dense<0.000000e+00> : vector<2x256xf32>
    %176 = tpu.matmul %174, %175, %cst_62 {dimension_numbers = #tpu.dot_dimension_numbers<[1], [0], [0], [1], [0, 0, 1, 1], [], []>} : vector<2x64xbf16>, vector<64x256xbf16>, vector<2x256xf32> -> vector<2x256xf32>
    %177 = arith.truncf %155 : vector<2x64xf32> to vector<2x64xbf16>
    %c0_63 = arith.constant 0 : index
    %c0_64 = arith.constant 0 : index
    %178 = vector.load %arg10[%c0_63, %c0_64] : memref<64x256xbf16, #tpu.memory_space<vmem>>, vector<64x256xbf16>
    %cst_65 = arith.constant dense<0.000000e+00> : vector<2x256xf32>
    %179 = tpu.matmul %177, %178, %cst_65 {dimension_numbers = #tpu.dot_dimension_numbers<[1], [0], [0], [1], [0, 0, 1, 1], [], []>} : vector<2x64xbf16>, vector<64x256xbf16>, vector<2x256xf32> -> vector<2x256xf32>
    %180 = arith.addf %176, %179 : vector<2x256xf32>
    %181 = arith.addf %180, %23 : vector<2x256xf32>
    %182 = arith.mulf %181, %32 : vector<2x256xf32>
    %183 = math.tanh %182 : vector<2x256xf32>
    %184 = arith.mulf %32, %183 : vector<2x256xf32>
    %185 = arith.addf %184, %35 : vector<2x256xf32>
    %186 = vector.extract_strided_slice %185 {offsets = [0, 0], sizes = [2, 64], strides = [1, 1]} : vector<2x256xf32> to vector<2x64xf32>
    %187 = vector.extract_strided_slice %185 {offsets = [0, 64], sizes = [2, 64], strides = [1, 1]} : vector<2x256xf32> to vector<2x64xf32>
    %188 = vector.extract_strided_slice %185 {offsets = [0, 128], sizes = [2, 64], strides = [1, 1]} : vector<2x256xf32> to vector<2x64xf32>
    %189 = vector.extract_strided_slice %185 {offsets = [0, 192], sizes = [2, 64], strides = [1, 1]} : vector<2x256xf32> to vector<2x64xf32>
    %190 = arith.mulf %187, %153 : vector<2x64xf32>
    %191 = arith.mulf %186, %188 : vector<2x64xf32>
    %192 = arith.addf %190, %191 : vector<2x64xf32>
    %193 = math.tanh %192 : vector<2x64xf32>
    %194 = arith.mulf %189, %193 : vector<2x64xf32>
    %c6 = arith.constant 6 : index
    %c0_66 = arith.constant 0 : index
    %195 = vector.load %arg18[%c6, %c0_66] : memref<16x64xf32, #tpu.memory_space<vmem>>, vector<2x64xf32>
    tpu.vector_store %arg18[%c6, %c0_66], %194 {strides = array<i32>} : memref<16x64xf32, #tpu.memory_space<vmem>>, vector<2x64xf32>,
    %196 = arith.truncf %173 : vector<2x64xf32> to vector<2x64xbf16>
    %c0_67 = arith.constant 0 : index
    %c0_68 = arith.constant 0 : index
    %197 = vector.load %arg7[%c0_67, %c0_68] : memref<64x256xbf16, #tpu.memory_space<vmem>>, vector<64x256xbf16>
    %cst_69 = arith.constant dense<0.000000e+00> : vector<2x256xf32>
    %198 = tpu.matmul %196, %197, %cst_69 {dimension_numbers = #tpu.dot_dimension_numbers<[1], [0], [0], [1], [0, 0, 1, 1], [], []>} : vector<2x64xbf16>, vector<64x256xbf16>, vector<2x256xf32> -> vector<2x256xf32>
    %199 = arith.addf %20, %198 : vector<2x256xf32>
    %200 = arith.mulf %199, %32 : vector<2x256xf32>
    %201 = math.tanh %200 : vector<2x256xf32>
    %202 = arith.mulf %32, %201 : vector<2x256xf32>
    %203 = arith.addf %202, %35 : vector<2x256xf32>
    %204 = vector.extract_strided_slice %203 {offsets = [0, 0], sizes = [2, 64], strides = [1, 1]} : vector<2x256xf32> to vector<2x64xf32>
    %205 = vector.extract_strided_slice %203 {offsets = [0, 64], sizes = [2, 64], strides = [1, 1]} : vector<2x256xf32> to vector<2x64xf32>
    %206 = vector.extract_strided_slice %203 {offsets = [0, 128], sizes = [2, 64], strides = [1, 1]} : vector<2x256xf32> to vector<2x64xf32>
    %207 = vector.extract_strided_slice %203 {offsets = [0, 192], sizes = [2, 64], strides = [1, 1]} : vector<2x256xf32> to vector<2x64xf32>
    %208 = arith.mulf %205, %171 : vector<2x64xf32>
    %209 = arith.mulf %204, %206 : vector<2x64xf32>
    %210 = arith.addf %208, %209 : vector<2x64xf32>
    %211 = math.tanh %210 : vector<2x64xf32>
    %212 = arith.mulf %207, %211 : vector<2x64xf32>
    %213 = arith.truncf %212 : vector<2x64xf32> to vector<2x64xbf16>
    %c0_70 = arith.constant 0 : index
    %c0_71 = arith.constant 0 : index
    %214 = vector.load %arg9[%c0_70, %c0_71] : memref<64x256xbf16, #tpu.memory_space<vmem>>, vector<64x256xbf16>
    %cst_72 = arith.constant dense<0.000000e+00> : vector<2x256xf32>
    %215 = tpu.matmul %213, %214, %cst_72 {dimension_numbers = #tpu.dot_dimension_numbers<[1], [0], [0], [1], [0, 0, 1, 1], [], []>} : vector<2x64xbf16>, vector<64x256xbf16>, vector<2x256xf32> -> vector<2x256xf32>
    %216 = arith.truncf %194 : vector<2x64xf32> to vector<2x64xbf16>
    %c0_73 = arith.constant 0 : index
    %c0_74 = arith.constant 0 : index
    %217 = vector.load %arg10[%c0_73, %c0_74] : memref<64x256xbf16, #tpu.memory_space<vmem>>, vector<64x256xbf16>
    %cst_75 = arith.constant dense<0.000000e+00> : vector<2x256xf32>
    %218 = tpu.matmul %216, %217, %cst_75 {dimension_numbers = #tpu.dot_dimension_numbers<[1], [0], [0], [1], [0, 0, 1, 1], [], []>} : vector<2x64xbf16>, vector<64x256xbf16>, vector<2x256xf32> -> vector<2x256xf32>
    %219 = arith.addf %215, %218 : vector<2x256xf32>
    %220 = arith.addf %219, %23 : vector<2x256xf32>
    %221 = arith.mulf %220, %32 : vector<2x256xf32>
    %222 = math.tanh %221 : vector<2x256xf32>
    %223 = arith.mulf %32, %222 : vector<2x256xf32>
    %224 = arith.addf %223, %35 : vector<2x256xf32>
    %225 = vector.extract_strided_slice %224 {offsets = [0, 0], sizes = [2, 64], strides = [1, 1]} : vector<2x256xf32> to vector<2x64xf32>
    %226 = vector.extract_strided_slice %224 {offsets = [0, 64], sizes = [2, 64], strides = [1, 1]} : vector<2x256xf32> to vector<2x64xf32>
    %227 = vector.extract_strided_slice %224 {offsets = [0, 128], sizes = [2, 64], strides = [1, 1]} : vector<2x256xf32> to vector<2x64xf32>
    %228 = vector.extract_strided_slice %224 {offsets = [0, 192], sizes = [2, 64], strides = [1, 1]} : vector<2x256xf32> to vector<2x64xf32>
    %229 = arith.mulf %226, %192 : vector<2x64xf32>
    %230 = arith.mulf %225, %227 : vector<2x64xf32>
    %231 = arith.addf %229, %230 : vector<2x64xf32>
    %232 = math.tanh %231 : vector<2x64xf32>
    %233 = arith.mulf %228, %232 : vector<2x64xf32>
    %c8 = arith.constant 8 : index
    %c0_76 = arith.constant 0 : index
    %234 = vector.load %arg18[%c8, %c0_76] : memref<16x64xf32, #tpu.memory_space<vmem>>, vector<2x64xf32>
    tpu.vector_store %arg18[%c8, %c0_76], %233 {strides = array<i32>} : memref<16x64xf32, #tpu.memory_space<vmem>>, vector<2x64xf32>,
    %235 = arith.truncf %212 : vector<2x64xf32> to vector<2x64xbf16>
    %c0_77 = arith.constant 0 : index
    %c0_78 = arith.constant 0 : index
    %236 = vector.load %arg7[%c0_77, %c0_78] : memref<64x256xbf16, #tpu.memory_space<vmem>>, vector<64x256xbf16>
    %cst_79 = arith.constant dense<0.000000e+00> : vector<2x256xf32>
    %237 = tpu.matmul %235, %236, %cst_79 {dimension_numbers = #tpu.dot_dimension_numbers<[1], [0], [0], [1], [0, 0, 1, 1], [], []>} : vector<2x64xbf16>, vector<64x256xbf16>, vector<2x256xf32> -> vector<2x256xf32>
    %238 = arith.addf %20, %237 : vector<2x256xf32>
    %239 = arith.mulf %238, %32 : vector<2x256xf32>
    %240 = math.tanh %239 : vector<2x256xf32>
    %241 = arith.mulf %32, %240 : vector<2x256xf32>
    %242 = arith.addf %241, %35 : vector<2x256xf32>
    %243 = vector.extract_strided_slice %242 {offsets = [0, 0], sizes = [2, 64], strides = [1, 1]} : vector<2x256xf32> to vector<2x64xf32>
    %244 = vector.extract_strided_slice %242 {offsets = [0, 64], sizes = [2, 64], strides = [1, 1]} : vector<2x256xf32> to vector<2x64xf32>
    %245 = vector.extract_strided_slice %242 {offsets = [0, 128], sizes = [2, 64], strides = [1, 1]} : vector<2x256xf32> to vector<2x64xf32>
    %246 = vector.extract_strided_slice %242 {offsets = [0, 192], sizes = [2, 64], strides = [1, 1]} : vector<2x256xf32> to vector<2x64xf32>
    %247 = arith.mulf %244, %210 : vector<2x64xf32>
    %248 = arith.mulf %243, %245 : vector<2x64xf32>
    %249 = arith.addf %247, %248 : vector<2x64xf32>
    %250 = math.tanh %249 : vector<2x64xf32>
    %251 = arith.mulf %246, %250 : vector<2x64xf32>
    %252 = arith.truncf %251 : vector<2x64xf32> to vector<2x64xbf16>
    %c0_80 = arith.constant 0 : index
    %c0_81 = arith.constant 0 : index
    %253 = vector.load %arg9[%c0_80, %c0_81] : memref<64x256xbf16, #tpu.memory_space<vmem>>, vector<64x256xbf16>
    %cst_82 = arith.constant dense<0.000000e+00> : vector<2x256xf32>
    %254 = tpu.matmul %252, %253, %cst_82 {dimension_numbers = #tpu.dot_dimension_numbers<[1], [0], [0], [1], [0, 0, 1, 1], [], []>} : vector<2x64xbf16>, vector<64x256xbf16>, vector<2x256xf32> -> vector<2x256xf32>
    %255 = arith.truncf %233 : vector<2x64xf32> to vector<2x64xbf16>
    %c0_83 = arith.constant 0 : index
    %c0_84 = arith.constant 0 : index
    %256 = vector.load %arg10[%c0_83, %c0_84] : memref<64x256xbf16, #tpu.memory_space<vmem>>, vector<64x256xbf16>
    %cst_85 = arith.constant dense<0.000000e+00> : vector<2x256xf32>
    %257 = tpu.matmul %255, %256, %cst_85 {dimension_numbers = #tpu.dot_dimension_numbers<[1], [0], [0], [1], [0, 0, 1, 1], [], []>} : vector<2x64xbf16>, vector<64x256xbf16>, vector<2x256xf32> -> vector<2x256xf32>
    %258 = arith.addf %254, %257 : vector<2x256xf32>
    %259 = arith.addf %258, %23 : vector<2x256xf32>
    %260 = arith.mulf %259, %32 : vector<2x256xf32>
    %261 = math.tanh %260 : vector<2x256xf32>
    %262 = arith.mulf %32, %261 : vector<2x256xf32>
    %263 = arith.addf %262, %35 : vector<2x256xf32>
    %264 = vector.extract_strided_slice %263 {offsets = [0, 0], sizes = [2, 64], strides = [1, 1]} : vector<2x256xf32> to vector<2x64xf32>
    %265 = vector.extract_strided_slice %263 {offsets = [0, 64], sizes = [2, 64], strides = [1, 1]} : vector<2x256xf32> to vector<2x64xf32>
    %266 = vector.extract_strided_slice %263 {offsets = [0, 128], sizes = [2, 64], strides = [1, 1]} : vector<2x256xf32> to vector<2x64xf32>
    %267 = vector.extract_strided_slice %263 {offsets = [0, 192], sizes = [2, 64], strides = [1, 1]} : vector<2x256xf32> to vector<2x64xf32>
    %268 = arith.mulf %265, %231 : vector<2x64xf32>
    %269 = arith.mulf %264, %266 : vector<2x64xf32>
    %270 = arith.addf %268, %269 : vector<2x64xf32>
    %271 = math.tanh %270 : vector<2x64xf32>
    %272 = arith.mulf %267, %271 : vector<2x64xf32>
    %c10 = arith.constant 10 : index
    %c0_86 = arith.constant 0 : index
    %273 = vector.load %arg18[%c10, %c0_86] : memref<16x64xf32, #tpu.memory_space<vmem>>, vector<2x64xf32>
    tpu.vector_store %arg18[%c10, %c0_86], %272 {strides = array<i32>} : memref<16x64xf32, #tpu.memory_space<vmem>>, vector<2x64xf32>,
    %274 = arith.truncf %251 : vector<2x64xf32> to vector<2x64xbf16>
    %c0_87 = arith.constant 0 : index
    %c0_88 = arith.constant 0 : index
    %275 = vector.load %arg7[%c0_87, %c0_88] : memref<64x256xbf16, #tpu.memory_space<vmem>>, vector<64x256xbf16>
    %cst_89 = arith.constant dense<0.000000e+00> : vector<2x256xf32>
    %276 = tpu.matmul %274, %275, %cst_89 {dimension_numbers = #tpu.dot_dimension_numbers<[1], [0], [0], [1], [0, 0, 1, 1], [], []>} : vector<2x64xbf16>, vector<64x256xbf16>, vector<2x256xf32> -> vector<2x256xf32>
    %277 = arith.addf %20, %276 : vector<2x256xf32>
    %278 = arith.mulf %277, %32 : vector<2x256xf32>
    %279 = math.tanh %278 : vector<2x256xf32>
    %280 = arith.mulf %32, %279 : vector<2x256xf32>
    %281 = arith.addf %280, %35 : vector<2x256xf32>
    %282 = vector.extract_strided_slice %281 {offsets = [0, 0], sizes = [2, 64], strides = [1, 1]} : vector<2x256xf32> to vector<2x64xf32>
    %283 = vector.extract_strided_slice %281 {offsets = [0, 64], sizes = [2, 64], strides = [1, 1]} : vector<2x256xf32> to vector<2x64xf32>
    %284 = vector.extract_strided_slice %281 {offsets = [0, 128], sizes = [2, 64], strides = [1, 1]} : vector<2x256xf32> to vector<2x64xf32>
    %285 = vector.extract_strided_slice %281 {offsets = [0, 192], sizes = [2, 64], strides = [1, 1]} : vector<2x256xf32> to vector<2x64xf32>
    %286 = arith.mulf %283, %249 : vector<2x64xf32>
    %287 = arith.mulf %282, %284 : vector<2x64xf32>
    %288 = arith.addf %286, %287 : vector<2x64xf32>
    %289 = math.tanh %288 : vector<2x64xf32>
    %290 = arith.mulf %285, %289 : vector<2x64xf32>
    %291 = arith.truncf %290 : vector<2x64xf32> to vector<2x64xbf16>
    %c0_90 = arith.constant 0 : index
    %c0_91 = arith.constant 0 : index
    %292 = vector.load %arg9[%c0_90, %c0_91] : memref<64x256xbf16, #tpu.memory_space<vmem>>, vector<64x256xbf16>
    %cst_92 = arith.constant dense<0.000000e+00> : vector<2x256xf32>
    %293 = tpu.matmul %291, %292, %cst_92 {dimension_numbers = #tpu.dot_dimension_numbers<[1], [0], [0], [1], [0, 0, 1, 1], [], []>} : vector<2x64xbf16>, vector<64x256xbf16>, vector<2x256xf32> -> vector<2x256xf32>
    %294 = arith.truncf %272 : vector<2x64xf32> to vector<2x64xbf16>
    %c0_93 = arith.constant 0 : index
    %c0_94 = arith.constant 0 : index
    %295 = vector.load %arg10[%c0_93, %c0_94] : memref<64x256xbf16, #tpu.memory_space<vmem>>, vector<64x256xbf16>
    %cst_95 = arith.constant dense<0.000000e+00> : vector<2x256xf32>
    %296 = tpu.matmul %294, %295, %cst_95 {dimension_numbers = #tpu.dot_dimension_numbers<[1], [0], [0], [1], [0, 0, 1, 1], [], []>} : vector<2x64xbf16>, vector<64x256xbf16>, vector<2x256xf32> -> vector<2x256xf32>
    %297 = arith.addf %293, %296 : vector<2x256xf32>
    %298 = arith.addf %297, %23 : vector<2x256xf32>
    %299 = arith.mulf %298, %32 : vector<2x256xf32>
    %300 = math.tanh %299 : vector<2x256xf32>
    %301 = arith.mulf %32, %300 : vector<2x256xf32>
    %302 = arith.addf %301, %35 : vector<2x256xf32>
    %303 = vector.extract_strided_slice %302 {offsets = [0, 0], sizes = [2, 64], strides = [1, 1]} : vector<2x256xf32> to vector<2x64xf32>
    %304 = vector.extract_strided_slice %302 {offsets = [0, 64], sizes = [2, 64], strides = [1, 1]} : vector<2x256xf32> to vector<2x64xf32>
    %305 = vector.extract_strided_slice %302 {offsets = [0, 128], sizes = [2, 64], strides = [1, 1]} : vector<2x256xf32> to vector<2x64xf32>
    %306 = vector.extract_strided_slice %302 {offsets = [0, 192], sizes = [2, 64], strides = [1, 1]} : vector<2x256xf32> to vector<2x64xf32>
    %307 = arith.mulf %304, %270 : vector<2x64xf32>
    %308 = arith.mulf %303, %305 : vector<2x64xf32>
    %309 = arith.addf %307, %308 : vector<2x64xf32>
    %310 = math.tanh %309 : vector<2x64xf32>
    %311 = arith.mulf %306, %310 : vector<2x64xf32>
    %c12 = arith.constant 12 : index
    %c0_96 = arith.constant 0 : index
    %312 = vector.load %arg18[%c12, %c0_96] : memref<16x64xf32, #tpu.memory_space<vmem>>, vector<2x64xf32>
    tpu.vector_store %arg18[%c12, %c0_96], %311 {strides = array<i32>} : memref<16x64xf32, #tpu.memory_space<vmem>>, vector<2x64xf32>,
    %313 = arith.truncf %290 : vector<2x64xf32> to vector<2x64xbf16>
    %c0_97 = arith.constant 0 : index
    %c0_98 = arith.constant 0 : index
    %314 = vector.load %arg7[%c0_97, %c0_98] : memref<64x256xbf16, #tpu.memory_space<vmem>>, vector<64x256xbf16>
    %cst_99 = arith.constant dense<0.000000e+00> : vector<2x256xf32>
    %315 = tpu.matmul %313, %314, %cst_99 {dimension_numbers = #tpu.dot_dimension_numbers<[1], [0], [0], [1], [0, 0, 1, 1], [], []>} : vector<2x64xbf16>, vector<64x256xbf16>, vector<2x256xf32> -> vector<2x256xf32>
    %316 = arith.addf %20, %315 : vector<2x256xf32>
    %317 = arith.mulf %316, %32 : vector<2x256xf32>
    %318 = math.tanh %317 : vector<2x256xf32>
    %319 = arith.mulf %32, %318 : vector<2x256xf32>
    %320 = arith.addf %319, %35 : vector<2x256xf32>
    %321 = vector.extract_strided_slice %320 {offsets = [0, 0], sizes = [2, 64], strides = [1, 1]} : vector<2x256xf32> to vector<2x64xf32>
    %322 = vector.extract_strided_slice %320 {offsets = [0, 64], sizes = [2, 64], strides = [1, 1]} : vector<2x256xf32> to vector<2x64xf32>
    %323 = vector.extract_strided_slice %320 {offsets = [0, 128], sizes = [2, 64], strides = [1, 1]} : vector<2x256xf32> to vector<2x64xf32>
    %324 = vector.extract_strided_slice %320 {offsets = [0, 192], sizes = [2, 64], strides = [1, 1]} : vector<2x256xf32> to vector<2x64xf32>
    %325 = arith.mulf %322, %288 : vector<2x64xf32>
    %326 = arith.mulf %321, %323 : vector<2x64xf32>
    %327 = arith.addf %325, %326 : vector<2x64xf32>
    %328 = math.tanh %327 : vector<2x64xf32>
    %329 = arith.mulf %324, %328 : vector<2x64xf32>
    %330 = arith.truncf %329 : vector<2x64xf32> to vector<2x64xbf16>
    %c0_100 = arith.constant 0 : index
    %c0_101 = arith.constant 0 : index
    %331 = vector.load %arg9[%c0_100, %c0_101] : memref<64x256xbf16, #tpu.memory_space<vmem>>, vector<64x256xbf16>
    %cst_102 = arith.constant dense<0.000000e+00> : vector<2x256xf32>
    %332 = tpu.matmul %330, %331, %cst_102 {dimension_numbers = #tpu.dot_dimension_numbers<[1], [0], [0], [1], [0, 0, 1, 1], [], []>} : vector<2x64xbf16>, vector<64x256xbf16>, vector<2x256xf32> -> vector<2x256xf32>
    %333 = arith.truncf %311 : vector<2x64xf32> to vector<2x64xbf16>
    %c0_103 = arith.constant 0 : index
    %c0_104 = arith.constant 0 : index
    %334 = vector.load %arg10[%c0_103, %c0_104] : memref<64x256xbf16, #tpu.memory_space<vmem>>, vector<64x256xbf16>
    %cst_105 = arith.constant dense<0.000000e+00> : vector<2x256xf32>
    %335 = tpu.matmul %333, %334, %cst_105 {dimension_numbers = #tpu.dot_dimension_numbers<[1], [0], [0], [1], [0, 0, 1, 1], [], []>} : vector<2x64xbf16>, vector<64x256xbf16>, vector<2x256xf32> -> vector<2x256xf32>
    %336 = arith.addf %332, %335 : vector<2x256xf32>
    %337 = arith.addf %336, %23 : vector<2x256xf32>
    %338 = arith.mulf %337, %32 : vector<2x256xf32>
    %339 = math.tanh %338 : vector<2x256xf32>
    %340 = arith.mulf %32, %339 : vector<2x256xf32>
    %341 = arith.addf %340, %35 : vector<2x256xf32>
    %342 = vector.extract_strided_slice %341 {offsets = [0, 0], sizes = [2, 64], strides = [1, 1]} : vector<2x256xf32> to vector<2x64xf32>
    %343 = vector.extract_strided_slice %341 {offsets = [0, 64], sizes = [2, 64], strides = [1, 1]} : vector<2x256xf32> to vector<2x64xf32>
    %344 = vector.extract_strided_slice %341 {offsets = [0, 128], sizes = [2, 64], strides = [1, 1]} : vector<2x256xf32> to vector<2x64xf32>
    %345 = vector.extract_strided_slice %341 {offsets = [0, 192], sizes = [2, 64], strides = [1, 1]} : vector<2x256xf32> to vector<2x64xf32>
    %346 = arith.mulf %343, %309 : vector<2x64xf32>
    %347 = arith.mulf %342, %344 : vector<2x64xf32>
    %348 = arith.addf %346, %347 : vector<2x64xf32>
    %349 = math.tanh %348 : vector<2x64xf32>
    %350 = arith.mulf %345, %349 : vector<2x64xf32>
    %c14 = arith.constant 14 : index
    %c0_106 = arith.constant 0 : index
    %351 = vector.load %arg18[%c14, %c0_106] : memref<16x64xf32, #tpu.memory_space<vmem>>, vector<2x64xf32>
    tpu.vector_store %arg18[%c14, %c0_106], %350 {strides = array<i32>} : memref<16x64xf32, #tpu.memory_space<vmem>>, vector<2x64xf32>,
    %c0_107 = arith.constant 0 : index
    %c0_108 = arith.constant 0 : index
    %352 = vector.load %arg18[%c0_107, %c0_108] : memref<16x64xf32, #tpu.memory_space<vmem>>, vector<16x64xf32>
    %353 = arith.truncf %352 : vector<16x64xf32> to vector<16x64xbf16>
    %c0_109 = arith.constant 0 : index
    %c0_110 = arith.constant 0 : index
    %354 = vector.load %arg12[%c0_109, %c0_110] : memref<64x48xbf16, #tpu.memory_space<vmem>>, vector<64x48xbf16>
    %cst_111 = arith.constant dense<0.000000e+00> : vector<16x48xf32>
    %355 = tpu.matmul %353, %354, %cst_111 {dimension_numbers = #tpu.dot_dimension_numbers<[1], [0], [0], [1], [0, 0, 1, 1], [], []>} : vector<16x64xbf16>, vector<64x48xbf16>, vector<16x48xf32> -> vector<16x48xf32>
    %c0_112 = arith.constant 0 : index
    %c0_113 = arith.constant 0 : index
    %356 = vector.load %arg13[%c0_112, %c0_113] : memref<1x48xf32, #tpu.memory_space<vmem>>, vector<1x48xf32>
    %357 = vector.broadcast %356 : vector<1x48xf32> to vector<16x48xf32>
    %358 = arith.addf %355, %357 : vector<16x48xf32>
    %cst_114 = arith.constant 0.000000e+00 : f32
    %359 = vector.broadcast %cst_114 : f32 to vector<16x48xf32>
    %360 = arith.maximumf %358, %359 : vector<16x48xf32>
    %361 = arith.truncf %360 : vector<16x48xf32> to vector<16x48xbf16>
    %c0_115 = arith.constant 0 : index
    %c0_116 = arith.constant 0 : index
    %362 = vector.load %arg14[%c0_115, %c0_116] : memref<48x32xbf16, #tpu.memory_space<vmem>>, vector<48x32xbf16>
    %cst_117 = arith.constant dense<0.000000e+00> : vector<16x32xf32>
    %363 = tpu.matmul %361, %362, %cst_117 {dimension_numbers = #tpu.dot_dimension_numbers<[1], [0], [0], [1], [0, 0, 1, 1], [], []>} : vector<16x48xbf16>, vector<48x32xbf16>, vector<16x32xf32> -> vector<16x32xf32>
    %c0_118 = arith.constant 0 : index
    %c0_119 = arith.constant 0 : index
    %364 = vector.load %arg15[%c0_118, %c0_119] : memref<1x32xf32, #tpu.memory_space<vmem>>, vector<1x32xf32>
    %365 = vector.broadcast %364 : vector<1x32xf32> to vector<16x32xf32>
    %366 = arith.addf %363, %365 : vector<16x32xf32>
    %cst_120 = arith.constant dense<0xFF800000> : vector<16xf32>
    %367 = vector.multi_reduction <maximumf>, %366, %cst_120 [1] : vector<16x32xf32> to vector<16xf32>
    %368 = vector.shape_cast %367 : vector<16xf32> to vector<16x1xf32>
    %369 = vector.broadcast %368 : vector<16x1xf32> to vector<16x32xf32>
    %370 = arith.subf %366, %369 : vector<16x32xf32>
    %371 = math.exp %370 : vector<16x32xf32>
    %cst_121 = arith.constant dense<0.000000e+00> : vector<16xf32>
    %372 = vector.multi_reduction <add>, %371, %cst_121 [1] : vector<16x32xf32> to vector<16xf32>
    %373 = vector.shape_cast %372 : vector<16xf32> to vector<16x1xf32>
    %374 = math.log %373 : vector<16x1xf32>
    %375 = arith.addf %368, %374 : vector<16x1xf32>
    %376 = vector.broadcast %375 : vector<16x1xf32> to vector<16x32xf32>
    %377 = arith.subf %366, %376 : vector<16x32xf32>
    %c0_122 = arith.constant 0 : index
    %c0_123 = arith.constant 0 : index
    %378 = vector.load %arg16[%c0_122, %c0_123] : memref<16x32xf32, #tpu.memory_space<vmem>>, vector<16x32xf32>
    tpu.vector_store %arg16[%c0_122, %c0_123], %377 {strides = array<i32>} : memref<16x32xf32, #tpu.memory_space<vmem>>, vector<16x32xf32>,
    %c0_124 = arith.constant 0 : index
    %c0_125 = arith.constant 0 : index
    %379 = vector.load %arg1[%c0_124, %c0_125] : memref<16x32xf32, #tpu.memory_space<vmem>>, vector<16x32xf32>
    %380 = arith.addf %377, %379 : vector<16x32xf32>
    %381 = tpu.iota {dimensions = array<i32: 1>} : vector<16x32xi32>
    %cst_126 = arith.constant dense<0xFF800000> : vector<16xf32>
    %382 = vector.multi_reduction <maximumf>, %380, %cst_126 [1] : vector<16x32xf32> to vector<16xf32>
    %383 = vector.shape_cast %382 : vector<16xf32> to vector<16x1xf32>
    %384 = vector.broadcast %383 : vector<16x1xf32> to vector<16x32xf32>
    %385 = arith.cmpf oge, %380, %384 : vector<16x32xf32>
    %c-1_i32 = arith.constant -1 : i32
    %386 = vector.broadcast %c-1_i32 : i32 to vector<16x32xi32>
    %387 = arith.select %385, %381, %386 : vector<16x32xi1>, vector<16x32xi32>
    %cst_127 = arith.constant dense<-2147483648> : vector<16xi32>
    %388 = vector.multi_reduction <maxsi>, %387, %cst_127 [1] : vector<16x32xi32> to vector<16xi32>
    %389 = vector.shape_cast %388 : vector<16xi32> to vector<16x1xi32>
    %c0_128 = arith.constant 0 : index
    %c0_129 = arith.constant 0 : index
    %390 = vector.load %arg17[%c0_128, %c0_129] : memref<16x1xi32, #tpu.memory_space<vmem>>, vector<16x1xi32>
    tpu.vector_store %arg17[%c0_128, %c0_129], %389 {strides = array<i32>} : memref<16x1xi32, #tpu.memory_space<vmem>>, vector<16x1xi32>,
    return
  }
}

</mosaic_0001>

<bundles_post_ra>
// kernel: my_bar_decoder_forward.1
= control target key start
LH: loop header
LB: loop body
LE: loop exit
PB: predicated region body
PF: predicated region fallthrough
CT: control target
= control target key end

     0   :  { %v3662_v0 = vmov 0.0   ;;  %vm3663_vm0 = vmmov 0   ;;  %vm73_vm1 = vcmask 130048   ;;  %vm150_vm2 = vcmask 1043456   ;;  %s4609_s2 = inlined_call_operand.vmem [shape: bf16[16,40], index: 2, kind: input, shape index: {}]   ;;  %s4610_s0 = inlined_call_operand.vmem [shape: f32[2,16], index: 0, kind: input, shape index: {}]   ;;  %s4611_s4 = inlined_call_operand.vmem [shape: bf16[40,64], index: 4, kind: input, shape index: {}]   ;;  %s4612_s7 = inlined_call_operand.vmem [shape: bf16[64,256], index: 7, kind: input, shape index: {}]   ;;  %s4613_s6 = inlined_call_operand.vmem [shape: bf16[64,256], index: 6, kind: input, shape index: {}]   ;;  %s4614_s3 = inlined_call_operand.vmem [shape: f32[1,40], index: 3, kind: input, shape index: {}]   ;;  %s4615_s5 = inlined_call_operand.vmem [shape: f32[1,64], index: 5, kind: input, shape index: {}]   ;;  %s4616_s8 = inlined_call_operand.vmem [shape: f32[1,256], index: 8, kind: input, shape index: {}]   ;;  %s4617_s10 = inlined_call_operand.vmem [shape: bf16[64,256], index: 10, kind: input, shape index: {}]   ;;  %s4618_s9 = inlined_call_operand.vmem [shape: bf16[64,256], index: 9, kind: input, shape index: {}]   ;;  %s4619_s11 = inlined_call_operand.vmem [shape: f32[1,256], index: 11, kind: input, shape index: {}]   ;;  %s4620_s12 = inlined_call_operand.vmem [shape: bf16[64,48], index: 12, kind: input, shape index: {}]   ;;  %s4621_s14 = inlined_call_operand.vmem [shape: bf16[48,32], index: 14, kind: input, shape index: {}]   ;;  %s4622_s13 = inlined_call_operand.vmem [shape: f32[1,48], index: 13, kind: input, shape index: {}]   ;;  %s4623_s15 = inlined_call_operand.vmem [shape: f32[1,32], index: 15, kind: input, shape index: {}]   ;;  %s4624_s1 = inlined_call_operand.vmem [shape: f32[16,32], index: 1, kind: input, shape index: {}]   ;;  %s4625_s16 = inlined_call_operand.vmem [shape: f32[16,32], index: 16, kind: output, shape index: {0}]   ;;  %s4626_s17 = inlined_call_operand.vmem [shape: s32[16,1], index: 17, kind: output, shape index: {1}]  }
   0x1   :  { %4627 = sst [smem:[#allocation3_spill]] %s4609_s2  ;;  %3420 = vmatprep.subr.bf16.mxu0 %v3662_v0  ;;  %3422 = vmatprep.mubr.msk.bf16.mxu0 %vm3663_vm0, %v3662_v0  ;;  %v3464_v4 = vld [vmem:[%s4611_s4] sm:$0xff]   ;;  %v3465_v5 = vld [vmem:[%s4611_s4 + $0x8] sm:$0xff]   ;;  %v3466_v6 = vld [vmem:[%s4611_s4 + $0x10] ss:$0 sps:$4 sm:$0xff]   ;;  %vm146_vm3 = vcmask 326656   ;;  %v205_v44 = vlaneseq }
   0x2   :  { %4628 = sst [smem:[#allocation4_spill]] %s4610_s0  ;;  %s4629_s26 = sld [smem:[#allocation3_spill]]  ;;  %3426 = vmatprep.subr.bf16.mxu1 %v3662_v0  ;;  %3432 = vmatprep.mubr.msk.bf16.mxu1 %vm3663_vm0, %v3662_v0  ;;  %v152_v7 = vsel %vm150_vm2, %v3466_v6, 0  ;;  %v3783_v8 = vld [vmem:[%s4612_s7 + $0x4] ss:$8 sps:$4 sm:$0xff]   ;;  %v3664_v32 = vmov 0  }
   0x3   :  { %s4630_s29 = sld [smem:[#allocation4_spill]]  ;;  %3427 = vmatpush3.bf16.msra.mxu1 %v3464_v4  ;;  %v3470_v9 = vld [vmem:[%s4613_s6] ss:$8 sps:$4 sm:$0xff]   ;;  %v3472_v10 = vld [vmem:[%s4613_s6 + $0x4] ss:$8 sps:$4 sm:$0xff]   ;;  %vm255_vm4 = vcmask 523264  }
   0x4   :  { %3428 = vmatprep.subr.bf16.mxu1 %v3662_v0  ;;  %v3476_v11 = vld [vmem:[%s4613_s6 + $0x10] ss:$8 sps:$4 sm:$0xff]   ;;  %v3478_v12 = vld [vmem:[%s4613_s6 + $0x14] ss:$8 sps:$4 sm:$0xff]   ;;  %v3484_v13 = vld [vmem:[%s4613_s6 + $0x24] ss:$8 sps:$4 sm:$0xff]  }
   0x5   :  { %v3482_v14 = vld [vmem:[%s4613_s6 + $0x20] ss:$8 sps:$4 sm:$0xff]   ;;  %v3815_v24 = vld [vmem:[%s4612_s7 + $0x14] ss:$8 sps:$4 sm:$0xff]   ;;  %v3821_v25 = vld [vmem:[%s4612_s7 + $0x10] ss:$8 sps:$4 sm:$0xff]  }
   0x6   :  { %v3163_v15 = vld [vmem:[%s4614_s3] ss:$0 sm:$0xff]  ;;  %v3827_v26 = vld [vmem:[%s4612_s7 + $0x24] ss:$8 sps:$4 sm:$0xff]   ;;  %v3840_v28 = vld [vmem:[%s4612_s7 + $0x34] ss:$8 sps:$4 sm:$0xff]  }
   0x7   :  { %3429 = vmatpush3.bf16.msra.mxu1 %v3465_v5  ;;  %v3810_v22 = vld [vmem:[%s4612_s7] ss:$8 sps:$4 sm:$0xff]   ;;  %v3845_v29 = vld [vmem:[%s4612_s7 + $0x30] ss:$8 sps:$4 sm:$0xff]   ;;  %v3490_v30 = vld [vmem:[%s4613_s6 + $0x34] ss:$8 sps:$4 sm:$0xff]  }
   0x8   :  { %v3463_v1 = vld [vmem:[%s4629_s26] sm:$0xff]   ;;  %3430 = vmatprep.subr.bf16.mxu1 %v3662_v0  ;;  %v3488_v31 = vld [vmem:[%s4613_s6 + $0x30] ss:$8 sps:$4 sm:$0xff]   ;;  %v3864_v45 = vshrl.u32 %v205_v44, 7  ;;  %v3866_v46 = vand.u32 127, %v205_v44  ;;  %v3665_v58 = vmov 0.5  }
   0x9   :  { %v56_v2 = vld [vmem:[%s4630_s29] sm:$0x3]  ;;  %3421 = vmatpush3.bf16.msra.mxu0 %v3463_v1  ;;  %vm644_vm6 = vcmask 517120   ;;  %vm3034_vm7 = vcmask 392192   ;;  %vm3079_vm8 = vcmask 261120   ;;  %vm3152_vm13 = vcmask 7168  }
   0xa   :  { %v57_v3 = vpack.c.bf16 %v56_v2, %v56_v2  ;;  %259 = vmatprep.subr.bf16.mxu0 %v3472_v10  ;;  %v3833_v27 = vld [vmem:[%s4612_s7 + $0x20] ss:$8 sps:$4 sm:$0xff]   ;;  %v207_v47 = vsub.s32 0, %v3864_v45  ;;  %v211_v49 = vsub.s32 1, %v3864_v45  ;;  %v314_v50 = vadd.s32 128, %v3866_v46 }
   0xb   :  { %3431 = vmatpush3.bf16.msra.mxu1 %v152_v7  ;;  %v3166_v33 = vld [vmem:[%s4615_s5] ss:$0 sm:$0xff] }
   0xc   :  { %3423 = vmatmul.mubr.msk.bf16.vlgmr.msra.gmra.mrb[0].mxu0 %vm73_vm1, %v57_v3  ;;  %376 = vmatprep.subr.bf16.mxu1 %v3783_v8  ;;  %v203_v48 = vld [vmem:[%s4616_s8] sm:$0x3]  ;;  %vm318_vm5 = vcmp.lt.s32.totalorder %v314_v50, 192  ;;  %s3666_s8 = smov 64  }
   0xd   :  { %260 = vmatpush1.bf16.msra.mxu0 %v3470_v9  ;;  %291 = vmatprep.mubr.bf16.mxu0 %v3664_v32  ;;  %v208_v51 = vrot.slane %v203_v48, %v207_v47  ;;  %v212_v52 = vrot.slane %v203_v48, %v211_v49  ;;  %v3883_v59 = vsel %vm318_vm5, 1.0, %v3665_v58  ;;  %v3889_v4 = vsel %vm318_vm5, 0.0, %v3665_v58  ;;  %v300_v50 = vld [vmem:[%s4619_s11] sm:$0x3] }
   0xe   :  { %261 = vmatprep.subr.bf16.mxu0 %v3478_v12  ;;  %v3902_v12 = vld [vmem:[%s4617_s10 + $0x4] ss:$8 sps:$4 sm:$0xff]  }
  0x11   :  { %262 = vmatpush1.bf16.msra.mxu0 %v3476_v11  ;;  %v3897_v11 = vld [vmem:[%s4617_s10] ss:$8 sps:$4 sm:$0xff]  }
  0x12   :  { %263 = vmatprep.subr.bf16.mxu0 %v3484_v13  ;;  %v3907_v13 = vld [vmem:[%s4617_s10 + $0x14] ss:$8 sps:$4 sm:$0xff]  }
  0x15   :  { %264 = vmatpush1.bf16.msra.mxu0 %v3482_v14  ;;  %v3914_v14 = vld [vmem:[%s4617_s10 + $0x10] ss:$8 sps:$4 sm:$0xff]  }
  0x16   :  { %265 = vmatprep.subr.bf16.mxu0 %v3490_v30  ;;  %v3965_v30 = vld [vmem:[%s4618_s9 + $0x24] ss:$8 sps:$4 sm:$0xff]  }
  0x19   :  { %266 = vmatpush1.bf16.msra.mxu0 %v3488_v31  ;;  %v3970_v31 = vld [vmem:[%s4618_s9 + $0x20] ss:$8 sps:$4 sm:$0xff]  }
  0x1a   :  { %493 = vmatprep.subr.bf16.mxu0 %v3902_v12 }
  0xdf   :  { %v111_v16 = vpop.f32.mrb[0].mxu0 }
  0xe0   :  { %v112_v17 = vadd.f32 %v3163_v15, %v111_v16  ;;  %v3424_v18 = vpop.f32.mrb[1].mxu0  ;;  %v3920_v15 = vld [vmem:[%s4617_s10 + $0x24] ss:$8 sps:$4 sm:$0xff]   ;;  %v3925_v16 = vld [vmem:[%s4618_s9] ss:$8 sps:$4 sm:$0xff]  }
  0xe1   :  { %v114_v19 = vpop.f32.mrb[2].mxu0  ;;  %v3935_v18 = vld [vmem:[%s4617_s10 + $0x20] ss:$8 sps:$4 sm:$0xff]  }
  0xe2   :  { %v117_v20 = vmax.f32 %v112_v17, 0.0  ;;  %v3425_v21 = vpop.f32.mrb[3].mxu0  ;;  %v3930_v17 = vld [vmem:[%s4618_s9 + $0x4] ss:$8 sps:$4 sm:$0xff]   ;;  %v3940_v19 = vld [vmem:[%s4618_s9 + $0x14] ss:$8 sps:$4 sm:$0xff]  }
  0xe3   :  { %v3954_v21 = vld [vmem:[%s4618_s9 + $0x10] ss:$8 sps:$4 sm:$0xff]  }
  0xe4   :  { %v118_v23 = vpack.c.bf16 %v117_v20, %v117_v20  ;;  %v3946_v20 = vld [vmem:[%s4617_s10 + $0x34] ss:$8 sps:$4 sm:$0xff]  }
  0xe6   :  { %3433 = vmatmul.mubr.msk.bf16.vlgmr.msra.gmra.mrb[0].mxu1 %vm146_vm3, %v118_v23  ;;  %v3959_v23 = vld [vmem:[%s4617_s10 + $0x30] ss:$8 sps:$4 sm:$0xff]  }
  0xe7   :  { %377 = vmatpush1.bf16.msra.mxu1 %v3810_v22  ;;  %408 = vmatprep.mubr.bf16.mxu1 %v3664_v32 }
  0xe8   :  { %378 = vmatprep.subr.bf16.mxu1 %v3815_v24 }
  0xeb   :  { %379 = vmatpush1.bf16.msra.mxu1 %v3821_v25 }
  0xec   :  { %380 = vmatprep.subr.bf16.mxu1 %v3827_v26 }
  0xef   :  { %381 = vmatpush1.bf16.msra.mxu1 %v3833_v27 }
  0xf0   :  { %382 = vmatprep.subr.bf16.mxu1 %v3840_v28 }
  0xf3   :  { %383 = vmatpush1.bf16.msra.mxu1 %v3845_v29 }
  0xf4   :  { %580 = vmatprep.subr.bf16.mxu1 %v3930_v17 }
  0xf6   :  { %409 = vmatmul.mubr.bf16.vlgmr.msra.gmra.mrb[4].mxu1 %v3664_v32 }
  0xf7   :  { %612 = vmatprep.mubr.bf16.mxu1 %v3664_v32  ;;  %581 = vmatpush1.bf16.msra.mxu1 %v3925_v16 }
  0xf8   :  { %582 = vmatprep.subr.bf16.mxu1 %v3940_v19 }
  0xfb   :  { %583 = vmatpush1.bf16.msra.mxu1 %v3954_v21 }
  0xfc   :  { %584 = vmatprep.subr.bf16.mxu1 %v3965_v30 }
  0xff   :  { %585 = vmatpush1.bf16.msra.mxu1 %v3970_v31 }
 0x1b9   :  { %v188_v34 = vpop.f32.mrb[0].mxu1 }
 0x1ba   :  { %v189_v35 = vadd.f32 %v3166_v33, %v188_v34  ;;  %v3434_v36 = vpop.f32.mrb[1].mxu1  ;;  %v3976_v33 = vld [vmem:[%s4618_s9 + $0x34] ss:$8 sps:$4 sm:$0xff]   ;;  %v3987_v34 = vld [vmem:[%s4618_s9 + $0x30] ss:$8 sps:$4 sm:$0xff]  }
 0x1bb   :  { %v191_v37 = vpop.f32.mrb[2].mxu1  ;;  %586 = vmatprep.subr.bf16.mxu1 %v3976_v33 }
 0x1bc   :  { %v194_v38 = vpack.c.bf16 %v189_v35, %v189_v35  ;;  %v3435_v39 = vpop.f32.mrb[3].mxu1  ;;  %587 = vmatpush1.bf16.msra.mxu1 %v3987_v34 }
 0x1bd   :  { %818 = vmatprep.subr.bf16.mxu1 %v3902_v12 }
 0x1be   :  { %3179 = vmatmul.mubr.msk.bf16.vlgmr.msra.gmra.mrb[4].mxu0 %vm255_vm4, %v194_v38 }
 0x1bf   :  { %525 = vmatprep.mubr.bf16.mxu0 %v3664_v32  ;;  %494 = vmatpush1.bf16.msra.mxu0 %v3897_v11 }
 0x1c0   :  { %495 = vmatprep.subr.bf16.mxu0 %v3907_v13 }
 0x1c3   :  { %496 = vmatpush1.bf16.msra.mxu0 %v3914_v14 }
 0x1c4   :  { %497 = vmatprep.subr.bf16.mxu0 %v3920_v15 }
 0x1c7   :  { %498 = vmatpush1.bf16.msra.mxu0 %v3935_v18 }
 0x1c8   :  { %499 = vmatprep.subr.bf16.mxu0 %v3946_v20 }
 0x1c9   :  { %v410_v40 = vpop.f32.mrb[4].mxu1 }
 0x1ca   :  { %v412_v41 = vpop.f32.mrb[5].mxu1 }
 0x1cb   :  { %v414_v42 = vpop.f32.mrb[6].mxu1  ;;  %500 = vmatpush1.bf16.msra.mxu0 %v3959_v23 }
 0x1cc   :  { %v415_v43 = vpop.f32.mrb[7].mxu1  ;;  %694 = vmatprep.subr.bf16.mxu0 %v3783_v8 }
 0x1ce   :  { %526 = vmatmul.mubr.bf16.vlgmr.msra.gmra.mrb[8].mxu0 %v3664_v32 }
 0x1cf   :  { %695 = vmatpush1.bf16.msra.mxu0 %v3810_v22  ;;  %726 = vmatprep.mubr.bf16.mxu0 %v3664_v32 }
 0x1d0   :  { %696 = vmatprep.subr.bf16.mxu0 %v3815_v24 }
 0x1d3   :  { %697 = vmatpush1.bf16.msra.mxu0 %v3821_v25 }
 0x1d4   :  { %698 = vmatprep.subr.bf16.mxu0 %v3827_v26 }
 0x1d7   :  { %699 = vmatpush1.bf16.msra.mxu0 %v3833_v27 }
 0x1d8   :  { %700 = vmatprep.subr.bf16.mxu0 %v3840_v28 }
 0x1db   :  { %701 = vmatpush1.bf16.msra.mxu0 %v3845_v29 }
 0x1dc   :  { %905 = vmatprep.subr.bf16.mxu0 %v3930_v17 }
 0x291   :  { %v293_v53 = vpop.f32.mrb[4].mxu0 }
 0x292   :  { %v3878_v54 = vadd.f32 %v293_v53, %v208_v51  ;;  %v295_v55 = vpop.f32.mrb[5].mxu0  ;;  %v4031_v51 = vrot.slane %v300_v50, %v207_v47 }
 0x293   :  { %v3880_v56 = vadd.f32 %v295_v55, %v212_v52  ;;  %v297_v57 = vpop.f32.mrb[6].mxu0  ;;  %v4035_v52 = vrot.slane %v300_v50, %v211_v49 }
 0x294   :  { %v298_v60 = vpop.f32.mrb[7].mxu0  ;;  %v417_v61 = vadd.f32 %v410_v40, %v3878_v54 }
 0x295   :  { %v418_v62 = vadd.f32 %v412_v41, %v3880_v56 }
 0x296   :  { %v419_v63 = vmul.f32 0.5, %v417_v61 }
 0x297   :  { %v420_v1 = vmul.f32 %v418_v62, %v3883_v59 }
 0x298   :  { %3558 = vtanh.f32 %v419_v63 }
 0x299   :  { %3560 = vtanh.f32 %v420_v1 }
 0x2a1   :  { %v527_v41 = vpop.f32.mrb[8].mxu0 }
 0x2a2   :  { %v3559_v2 = vpop.eup %3558  ;;  %v529_v42 = vpop.f32.mrb[9].mxu0 }
 0x2a3   :  { %v3561_v3 = vpop.eup %3560  ;;  %v423_v5 = vmul.f32 0.5, %v3559_v2  ;;  %v531_v43 = vpop.f32.mrb[10].mxu0 }
 0x2a4   :  { %v424_v6 = vmul.f32 %v3561_v3, %v3883_v59  ;;  %v532_v44 = vpop.f32.mrb[11].mxu0 }
 0x2a5   :  { %v425_v7 = vadd.f32 0.5, %v423_v5 }
 0x2a6   :  { %v426_v9 = vadd.f32 %v424_v6, %v3889_v4 }
 0x2a7   :  { %v427_v35 = vmul.f32 0.0, %v425_v7 }
 0x2a8   :  { %v428_v10 = vmul.f32 %v426_v9, %v425_v7 }
 0x2aa   :  { %430 = vrot.lane.b32.xlu0 %v428_v10, %s3666_s8 }
 0x31c   :  { %v431_v36 = vpop.permute.xlu0 %430 }
 0x31d   :  { %v4002_v37 = vadd.f32 %v431_v36, %v427_v35 }
 0x31f   :  { %3562 = vtanh.f32 %v4002_v37 }
 0x329   :  { %v3563_v38 = vpop.eup %3562 }
 0x32a   :  { %v435_v39 = vmul.f32 %v3563_v38, %v426_v9 }
 0x32c   :  { %v436_v40 = vpack.c.bf16 %v435_v39, %v435_v39 }
 0x32e   :  { %535 = vrot.lane.b32.xlu0 %v436_v40, %s3666_s8 }
 0x3a0   :  { %v536_v48 = vpop.permute.xlu0 %535 }
 0x3a1   :  { %3204 = vmatmul.mubr.msk.bf16.vlgmr.msra.gmra.mrb[8].mxu1 %vm255_vm4, %v536_v48  ;;  %3213 = vmatmul.mubr.msk.bf16.vlgmr.msra.gmra.mrb[12].mxu0 %vm255_vm4, %v536_v48 }
 0x3a2   :  { %819 = vmatpush1.bf16.msra.mxu1 %v3897_v11  ;;  %906 = vmatpush1.bf16.msra.mxu0 %v3925_v16 }
 0x3a3   :  { %820 = vmatprep.subr.bf16.mxu1 %v3907_v13  ;;  %907 = vmatprep.subr.bf16.mxu0 %v3940_v19 }
 0x3a4   :  { %850 = vmatprep.mubr.bf16.mxu1 %v3664_v32  ;;  %937 = vmatprep.mubr.bf16.mxu0 %v3664_v32 }
 0x3a6   :  { %821 = vmatpush1.bf16.msra.mxu1 %v3914_v14  ;;  %908 = vmatpush1.bf16.msra.mxu0 %v3954_v21 }
 0x3a7   :  { %822 = vmatprep.subr.bf16.mxu1 %v3920_v15  ;;  %909 = vmatprep.subr.bf16.mxu0 %v3965_v30 }
 0x3aa   :  { %823 = vmatpush1.bf16.msra.mxu1 %v3935_v18  ;;  %910 = vmatpush1.bf16.msra.mxu0 %v3970_v31 }
 0x3ab   :  { %824 = vmatprep.subr.bf16.mxu1 %v3946_v20  ;;  %911 = vmatprep.subr.bf16.mxu0 %v3976_v33 }
 0x3ae   :  { %825 = vmatpush1.bf16.msra.mxu1 %v3959_v23  ;;  %912 = vmatpush1.bf16.msra.mxu0 %v3987_v34 }
 0x3af   :  { %1018 = vmatprep.subr.bf16.mxu1 %v3783_v8  ;;  %1142 = vmatprep.subr.bf16.mxu0 %v3902_v12 }
 0x474   :  { %v614_v53 = vpop.f32.mrb[8].mxu1  ;;  %v728_v55 = vpop.f32.mrb[12].mxu0 }
 0x475   :  { %v615_v57 = vadd.f32 %v614_v53, %v527_v41  ;;  %v735_v58 = vadd.f32 %v728_v55, %v3878_v54  ;;  %v616_v60 = vpop.f32.mrb[9].mxu1  ;;  %v730_v61 = vpop.f32.mrb[13].mxu0 }
 0x476   :  { %v617_v62 = vadd.f32 %v616_v60, %v529_v42  ;;  %v736_v63 = vadd.f32 %v730_v61, %v3880_v56  ;;  %v618_v1 = vpop.f32.mrb[10].mxu1  ;;  %v732_v2 = vpop.f32.mrb[14].mxu0 }
 0x477   :  { %v621_v3 = vadd.f32 %v615_v57, %v4031_v51  ;;  %v737_v47 = vmul.f32 0.5, %v735_v58  ;;  %v619_v5 = vpop.f32.mrb[11].mxu1  ;;  %v733_v6 = vpop.f32.mrb[15].mxu0 }
 0x478   :  { %v622_v45 = vadd.f32 %v617_v62, %v4035_v52  ;;  %v738_v49 = vmul.f32 %v736_v63, %v3883_v59 }
 0x479   :  { %v623_v7 = vmul.f32 0.5, %v621_v3  ;;  %3564 = vtanh.f32 %v737_v47 }
 0x47a   :  { %v624_v9 = vmul.f32 %v622_v45, %v3883_v59  ;;  %3566 = vtanh.f32 %v738_v49 }
 0x47b   :  { %3568 = vtanh.f32 %v623_v7 }
 0x47c   :  { %3570 = vtanh.f32 %v624_v9 }
 0x483   :  { %v3565_v10 = vpop.eup %3564 }
 0x484   :  { %v3567_v35 = vpop.eup %3566  ;;  %v741_v40 = vmul.f32 0.5, %v3565_v10 }
 0x485   :  { %v3569_v36 = vpop.eup %3568  ;;  %v742_v42 = vmul.f32 %v3567_v35, %v3883_v59 }
 0x486   :  { %v3571_v38 = vpop.eup %3570  ;;  %v627_v39 = vmul.f32 0.5, %v3569_v36  ;;  %v743_v48 = vadd.f32 0.5, %v741_v40 }
 0x487   :  { %v628_v41 = vmul.f32 %v3571_v38, %v3883_v59  ;;  %v744_v53 = vadd.f32 %v742_v42, %v3889_v4 }
 0x488   :  { %v629_v43 = vadd.f32 0.5, %v627_v39  ;;  %v745_v61 = vmul.f32 %v743_v48, %v4002_v37 }
 0x489   :  { %v630_v44 = vadd.f32 %v628_v41, %v3889_v4  ;;  %v746_v55 = vmul.f32 %v744_v53, %v743_v48 }
 0x48a   :  { %v631_v57 = vmul.f32 0.0, %v629_v43 }
 0x48b   :  { %v632_v50 = vmul.f32 %v630_v44, %v629_v43 }
 0x48d   :  { %634 = vrot.lane.b32.xlu1 %v632_v50, %s3666_s8 }
 0x491   :  { %748 = vrot.lane.b32.xlu1 %v746_v55, %s3666_s8 }
 0x4ff   :  { %v635_v58 = vpop.permute.xlu1 %634 }
 0x500   :  { %v4049_v60 = vadd.f32 %v635_v58, %v631_v57 }
 0x502   :  { %3572 = vtanh.f32 %v4049_v60 }
 0x503   :  { %v749_v62 = vpop.permute.xlu1 %748 }
 0x504   :  { %v4053_v63 = vadd.f32 %v749_v62, %v745_v61 }
 0x506   :  { %3574 = vtanh.f32 %v4053_v63 }
 0x50c   :  { %v3573_v1 = vpop.eup %3572 }
 0x50d   :  { %v4056_v2 = vmul.f32 %v3573_v1, %v630_v44 }
 0x50f   :  { %v763_v3 = vpack.c.bf16 %v4056_v2, %v4056_v2 }
 0x510   :  { %v3575_v47 = vpop.eup %3574 }
 0x511   :  { %773 = vrot.lane.b32.xlu0 %v763_v3, %s3666_s8  ;;  %v753_v5 = vmul.f32 %v3575_v47, %v744_v53 }
 0x513   :  { %v754_v6 = vpack.c.bf16 %v753_v5, %v753_v5 }
 0x515   :  { %860 = vrot.lane.b32.xlu1 %v754_v6, %s3666_s8 }
 0x583   :  { %v774_v45 = vpop.permute.xlu0 %773 }
 0x584   :  { %3222 = vmatmul.mubr.msk.bf16.vlgmr.msra.gmra.mrb[12].mxu1 %vm255_vm4, %v774_v45 }
 0x585   :  { %1019 = vmatpush1.bf16.msra.mxu1 %v3810_v22  ;;  %1050 = vmatprep.mubr.bf16.mxu1 %v3664_v32 }
 0x586   :  { %1020 = vmatprep.subr.bf16.mxu1 %v3815_v24 }
 0x587   :  { %v861_v37 = vpop.permute.xlu1 %860 }
 0x588   :  { %3231 = vmatmul.mubr.msk.bf16.vlgmr.msra.gmra.mrb[16].mxu0 %vm255_vm4, %v861_v37 }
 0x589   :  { %1021 = vmatpush1.bf16.msra.mxu1 %v3821_v25  ;;  %1143 = vmatpush1.bf16.msra.mxu0 %v3897_v11 }
 0x58a   :  { %1022 = vmatprep.subr.bf16.mxu1 %v3827_v26  ;;  %1144 = vmatprep.subr.bf16.mxu0 %v3907_v13 }
 0x58b   :  { %1174 = vmatprep.mubr.bf16.mxu0 %v3664_v32 }
 0x58d   :  { %1023 = vmatpush1.bf16.msra.mxu1 %v3833_v27  ;;  %1145 = vmatpush1.bf16.msra.mxu0 %v3914_v14 }
 0x58e   :  { %1024 = vmatprep.subr.bf16.mxu1 %v3840_v28  ;;  %1146 = vmatprep.subr.bf16.mxu0 %v3920_v15 }
 0x591   :  { %1025 = vmatpush1.bf16.msra.mxu1 %v3845_v29  ;;  %1147 = vmatpush1.bf16.msra.mxu0 %v3935_v18 }
 0x592   :  { %1229 = vmatprep.subr.bf16.mxu1 %v3930_v17  ;;  %1148 = vmatprep.subr.bf16.mxu0 %v3946_v20 }
 0x594   :  { %3240 = vmatmul.mubr.msk.bf16.vlgmr.msra.gmra.mrb[16].mxu1 %vm255_vm4, %v861_v37 }
 0x595   :  { %1230 = vmatpush1.bf16.msra.mxu1 %v3925_v16  ;;  %1149 = vmatpush1.bf16.msra.mxu0 %v3959_v23 }
 0x596   :  { %1231 = vmatprep.subr.bf16.mxu1 %v3940_v19  ;;  %1342 = vmatprep.subr.bf16.mxu0 %v3783_v8 }
 0x597   :  { %1261 = vmatprep.mubr.bf16.mxu1 %v3664_v32 }
 0x599   :  { %1232 = vmatpush1.bf16.msra.mxu1 %v3954_v21 }
 0x59a   :  { %1233 = vmatprep.subr.bf16.mxu1 %v3965_v30 }
 0x59d   :  { %1234 = vmatpush1.bf16.msra.mxu1 %v3970_v31 }
 0x59e   :  { %1235 = vmatprep.subr.bf16.mxu1 %v3976_v33 }
 0x5a1   :  { %1236 = vmatpush1.bf16.msra.mxu1 %v3987_v34 }
 0x5a2   :  { %1466 = vmatprep.subr.bf16.mxu1 %v3902_v12 }
 0x657   :  { %v852_v49 = vpop.f32.mrb[12].mxu1 }
 0x658   :  { %v854_v7 = vpop.f32.mrb[13].mxu1 }
 0x659   :  { %v856_v9 = vpop.f32.mrb[14].mxu1 }
 0x65a   :  { %v857_v10 = vpop.f32.mrb[15].mxu1 }
 0x65b   :  { %v939_v35 = vpop.f32.mrb[16].mxu0 }
 0x65c   :  { %v940_v8 = vadd.f32 %v939_v35, %v852_v49  ;;  %v941_v36 = vpop.f32.mrb[17].mxu0 }
 0x65d   :  { %v942_v38 = vadd.f32 %v941_v36, %v854_v7  ;;  %v943_v39 = vpop.f32.mrb[18].mxu0 }
 0x65e   :  { %v946_v40 = vadd.f32 %v940_v8, %v4031_v51  ;;  %v944_v41 = vpop.f32.mrb[19].mxu0 }
 0x65f   :  { %v947_v42 = vadd.f32 %v942_v38, %v4035_v52 }
 0x660   :  { %v948_v43 = vmul.f32 0.5, %v946_v40 }
 0x661   :  { %v949_v44 = vmul.f32 %v947_v42, %v3883_v59 }
 0x662   :  { %3576 = vtanh.f32 %v948_v43 }
 0x663   :  { %3578 = vtanh.f32 %v949_v44 }
 0x667   :  { %v1052_v12 = vpop.f32.mrb[16].mxu1 }
 0x668   :  { %v1059_v48 = vadd.f32 %v1052_v12, %v3878_v54  ;;  %v1054_v50 = vpop.f32.mrb[17].mxu1 }
 0x669   :  { %v1060_v53 = vadd.f32 %v1054_v50, %v3880_v56  ;;  %v1056_v55 = vpop.f32.mrb[18].mxu1 }
 0x66a   :  { %v1061_v57 = vmul.f32 0.5, %v1059_v48  ;;  %v1057_v58 = vpop.f32.mrb[19].mxu1 }
 0x66b   :  { %v1062_v61 = vmul.f32 %v1060_v53, %v3883_v59 }
 0x66c   :  { %v3577_v62 = vpop.eup %3576  ;;  %3580 = vtanh.f32 %v1061_v57 }
 0x66d   :  { %v3579_v1 = vpop.eup %3578  ;;  %v952_v3 = vmul.f32 0.5, %v3577_v62  ;;  %3582 = vtanh.f32 %v1062_v61 }
 0x66e   :  { %v953_v47 = vmul.f32 %v3579_v1, %v3883_v59 }
 0x66f   :  { %v954_v5 = vadd.f32 0.5, %v952_v3 }
 0x670   :  { %v955_v6 = vadd.f32 %v953_v47, %v3889_v4 }
 0x671   :  { %v956_v36 = vmul.f32 %v954_v5, %v4049_v60 }
 0x672   :  { %v957_v45 = vmul.f32 %v955_v6, %v954_v5 }
 0x674   :  { %959 = vrot.lane.b32.xlu0 %v957_v45, %s3666_s8 }
 0x676   :  { %v3581_v37 = vpop.eup %3580 }
 0x677   :  { %v3583_v49 = vpop.eup %3582  ;;  %v1065_v7 = vmul.f32 0.5, %v3581_v37 }
 0x678   :  { %v1066_v9 = vmul.f32 %v3583_v49, %v3883_v59 }
 0x679   :  { %v1067_v10 = vadd.f32 0.5, %v1065_v7 }
 0x67a   :  { %v1068_v35 = vadd.f32 %v1066_v9, %v3889_v4  ;;  %v4161_v9 = vld [vmem:[%s4612_s7 + $0x4] ss:$8 sps:$4 sm:$0xff]  }
 0x67b   :  { %v1069_v40 = vmul.f32 %v1067_v10, %v4053_v63 }
 0x67c   :  { %v1070_v8 = vmul.f32 %v1068_v35, %v1067_v10 }
 0x67e   :  { %1072 = vrot.lane.b32.xlu1 %v1070_v8, %s3666_s8 }
 0x6e6   :  { %v960_v38 = vpop.permute.xlu0 %959 }
 0x6e7   :  { %v4105_v39 = vadd.f32 %v960_v38, %v956_v36 }
 0x6e9   :  { %3584 = vtanh.f32 %v4105_v39 }
 0x6f0   :  { %v1073_v41 = vpop.permute.xlu1 %1072 }
 0x6f1   :  { %v4109_v42 = vadd.f32 %v1073_v41, %v1069_v40 }
 0x6f3   :  { %v3585_v43 = vpop.eup %3584  ;;  %3586 = vtanh.f32 %v4109_v42 }
 0x6f4   :  { %v4112_v44 = vmul.f32 %v3585_v43, %v955_v6 }
 0x6f6   :  { %v1087_v12 = vpack.c.bf16 %v4112_v44, %v4112_v44 }
 0x6f8   :  { %1097 = vrot.lane.b32.xlu0 %v1087_v12, %s3666_s8 }
 0x6fd   :  { %v3587_v60 = vpop.eup %3586 }
 0x6fe   :  { %v1077_v48 = vmul.f32 %v3587_v60, %v1068_v35 }
 0x700   :  { %v1078_v50 = vpack.c.bf16 %v1077_v48, %v1077_v48 }
 0x702   :  { %1184 = vrot.lane.b32.xlu1 %v1078_v50, %s3666_s8  ;;  %v4186_v50 = vld [vmem:[%s4612_s7 + $0x14] ss:$8 sps:$4 sm:$0xff]  }
 0x76a   :  { %v1098_v53 = vpop.permute.xlu0 %1097 }
 0x76b   :  { %3249 = vmatmul.mubr.msk.bf16.vlgmr.msra.gmra.mrb[20].mxu0 %vm255_vm4, %v1098_v53 }
 0x76c   :  { %1343 = vmatpush1.bf16.msra.mxu0 %v3810_v22  ;;  %1374 = vmatprep.mubr.bf16.mxu0 %v3664_v32 }
 0x76d   :  { %1344 = vmatprep.subr.bf16.mxu0 %v3815_v24 }
 0x770   :  { %1345 = vmatpush1.bf16.msra.mxu0 %v3821_v25 }
 0x771   :  { %1346 = vmatprep.subr.bf16.mxu0 %v3827_v26 }
 0x774   :  { %1347 = vmatpush1.bf16.msra.mxu0 %v3833_v27  ;;  %v1185_v63 = vpop.permute.xlu1 %1184 }
 0x775   :  { %3258 = vmatmul.mubr.msk.bf16.vlgmr.msra.gmra.mrb[20].mxu1 %vm255_vm4, %v1185_v63  ;;  %1348 = vmatprep.subr.bf16.mxu0 %v3840_v28 }
 0x776   :  { %1467 = vmatpush1.bf16.msra.mxu1 %v3897_v11  ;;  %1498 = vmatprep.mubr.bf16.mxu1 %v3664_v32 }
 0x777   :  { %1468 = vmatprep.subr.bf16.mxu1 %v3907_v13 }
 0x778   :  { %1349 = vmatpush1.bf16.msra.mxu0 %v3845_v29 }
 0x779   :  { %1553 = vmatprep.subr.bf16.mxu0 %v3930_v17 }
 0x77a   :  { %1469 = vmatpush1.bf16.msra.mxu1 %v3914_v14 }
 0x77b   :  { %3267 = vmatmul.mubr.msk.bf16.vlgmr.msra.gmra.mrb[24].mxu0 %vm255_vm4, %v1185_v63  ;;  %1470 = vmatprep.subr.bf16.mxu1 %v3920_v15  ;;  %v4193_v63 = vld [vmem:[%s4612_s7 + $0x10] ss:$8 sps:$4 sm:$0xff]  }
 0x77c   :  { %1554 = vmatpush1.bf16.msra.mxu0 %v3925_v16  ;;  %1585 = vmatprep.mubr.bf16.mxu0 %v3664_v32 }
 0x77d   :  { %1555 = vmatprep.subr.bf16.mxu0 %v3940_v19 }
 0x77e   :  { %1471 = vmatpush1.bf16.msra.mxu1 %v3935_v18 }
 0x77f   :  { %1472 = vmatprep.subr.bf16.mxu1 %v3946_v20 }
 0x780   :  { %1556 = vmatpush1.bf16.msra.mxu0 %v3954_v21 }
 0x781   :  { %1557 = vmatprep.subr.bf16.mxu0 %v3965_v30 }
 0x782   :  { %1473 = vmatpush1.bf16.msra.mxu1 %v3959_v23 }
 0x783   :  { %1666 = vmatprep.subr.bf16.mxu1 %v4161_v9 }
 0x784   :  { %1558 = vmatpush1.bf16.msra.mxu0 %v3970_v31 }
 0x785   :  { %1559 = vmatprep.subr.bf16.mxu0 %v3976_v33 }
 0x788   :  { %1560 = vmatpush1.bf16.msra.mxu0 %v3987_v34 }
 0x83e   :  { %v1176_v22 = vpop.f32.mrb[20].mxu0 }
 0x83f   :  { %v1178_v24 = vpop.f32.mrb[21].mxu0 }
 0x840   :  { %v1180_v25 = vpop.f32.mrb[22].mxu0 }
 0x841   :  { %v1181_v26 = vpop.f32.mrb[23].mxu0  ;;  %v4207_v25 = vld [vmem:[%s4612_s7 + $0x20] ss:$8 sps:$4 sm:$0xff]  }
 0x842   :  { %v4214_v26 = vld [vmem:[%s4612_s7 + $0x34] ss:$8 sps:$4 sm:$0xff]  }
 0x848   :  { %v1263_v27 = vpop.f32.mrb[20].mxu1 }
 0x849   :  { %v1264_v28 = vadd.f32 %v1263_v27, %v1176_v22  ;;  %v1265_v29 = vpop.f32.mrb[21].mxu1  ;;  %v4200_v22 = vld [vmem:[%s4612_s7 + $0x24] ss:$8 sps:$4 sm:$0xff]   ;;  %v4220_v27 = vld [vmem:[%s4612_s7 + $0x30] ss:$8 sps:$4 sm:$0xff]  }
 0x84a   :  { %v1266_v11 = vadd.f32 %v1265_v29, %v1178_v24  ;;  %v1267_v13 = vpop.f32.mrb[22].mxu1 }
 0x84b   :  { %v1270_v14 = vadd.f32 %v1264_v28, %v4031_v51  ;;  %v1268_v15 = vpop.f32.mrb[23].mxu1 }
 0x84c   :  { %v1271_v16 = vadd.f32 %v1266_v11, %v4035_v52 }
 0x84d   :  { %v1272_v17 = vmul.f32 0.5, %v1270_v14 }
 0x84e   :  { %v1273_v18 = vmul.f32 %v1271_v16, %v3883_v59  ;;  %v1376_v19 = vpop.f32.mrb[24].mxu0 }
 0x84f   :  { %3588 = vtanh.f32 %v1272_v17  ;;  %v1383_v20 = vadd.f32 %v1376_v19, %v3878_v54  ;;  %v1378_v21 = vpop.f32.mrb[25].mxu0 }
 0x850   :  { %3590 = vtanh.f32 %v1273_v18  ;;  %v1384_v23 = vadd.f32 %v1378_v21, %v3880_v56  ;;  %v1380_v30 = vpop.f32.mrb[26].mxu0 }
 0x851   :  { %v1385_v31 = vmul.f32 0.5, %v1383_v20  ;;  %v1381_v33 = vpop.f32.mrb[27].mxu0 }
 0x852   :  { %v1386_v34 = vmul.f32 %v1384_v23, %v3883_v59 }
 0x853   :  { %3592 = vtanh.f32 %v1385_v31 }
 0x854   :  { %3594 = vtanh.f32 %v1386_v34 }
 0x859   :  { %v3589_v55 = vpop.eup %3588 }
 0x85a   :  { %v3591_v57 = vpop.eup %3590  ;;  %v1276_v58 = vmul.f32 0.5, %v3589_v55 }
 0x85b   :  { %v1277_v61 = vmul.f32 %v3591_v57, %v3883_v59 }
 0x85c   :  { %v1278_v62 = vadd.f32 0.5, %v1276_v58 }
 0x85d   :  { %v3593_v1 = vpop.eup %3592  ;;  %v1279_v3 = vadd.f32 %v1277_v61, %v3889_v4 }
 0x85e   :  { %v3595_v47 = vpop.eup %3594  ;;  %v1389_v5 = vmul.f32 0.5, %v3593_v1  ;;  %v1280_v10 = vmul.f32 %v1278_v62, %v4105_v39 }
 0x85f   :  { %v1281_v6 = vmul.f32 %v1279_v3, %v1278_v62  ;;  %v1390_v45 = vmul.f32 %v3595_v47, %v3883_v59 }
 0x860   :  { %v1391_v37 = vadd.f32 0.5, %v1389_v5 }
 0x861   :  { %1283 = vrot.lane.b32.xlu0 %v1281_v6, %s3666_s8  ;;  %v1392_v49 = vadd.f32 %v1390_v45, %v3889_v4 }
 0x862   :  { %v1393_v36 = vmul.f32 %v1391_v37, %v4109_v42  ;;  %v4181_v42 = vld [vmem:[%s4612_s7] ss:$8 sps:$4 sm:$0xff]  }
 0x863   :  { %v1394_v7 = vmul.f32 %v1392_v49, %v1391_v37 }
 0x865   :  { %1396 = vrot.lane.b32.xlu1 %v1394_v7, %s3666_s8 }
 0x8d3   :  { %v1284_v35 = vpop.permute.xlu0 %1283 }
 0x8d4   :  { %v4165_v8 = vadd.f32 %v1284_v35, %v1280_v10 }
 0x8d6   :  { %3596 = vtanh.f32 %v4165_v8 }
 0x8d7   :  { %v1397_v38 = vpop.permute.xlu1 %1396 }
 0x8d8   :  { %v4169_v40 = vadd.f32 %v1397_v38, %v1393_v36 }
 0x8da   :  { %3598 = vtanh.f32 %v4169_v40 }
 0x8e0   :  { %v3597_v41 = vpop.eup %3596 }
 0x8e1   :  { %v4172_v43 = vmul.f32 %v3597_v41, %v1279_v3 }
 0x8e3   :  { %v1411_v12 = vpack.c.bf16 %v4172_v43, %v4172_v43 }
 0x8e4   :  { %v3599_v60 = vpop.eup %3598 }
 0x8e5   :  { %1421 = vrot.lane.b32.xlu0 %v1411_v12, %s3666_s8  ;;  %v1401_v39 = vmul.f32 %v3599_v60, %v1392_v49  ;;  %v4241_v12 = vld [vmem:[%s4617_s10] ss:$8 sps:$4 sm:$0xff]   ;;  %v4246_v60 = vld [vmem:[%s4617_s10 + $0x4] ss:$8 sps:$4 sm:$0xff]  }
 0x8e6   :  { %1790 = vmatprep.subr.bf16.mxu0 %v4246_v60 }
 0x8e7   :  { %v1402_v48 = vpack.c.bf16 %v1401_v39, %v1401_v39  ;;  %v4251_v39 = vld [vmem:[%s4617_s10 + $0x14] ss:$8 sps:$4 sm:$0xff]  }
 0x8e9   :  { %1508 = vrot.lane.b32.xlu1 %v1402_v48, %s3666_s8  ;;  %v4257_v48 = vld [vmem:[%s4618_s9] ss:$8 sps:$4 sm:$0xff]  }
 0x957   :  { %v1422_v53 = vpop.permute.xlu0 %1421 }
 0x958   :  { %3276 = vmatmul.mubr.msk.bf16.vlgmr.msra.gmra.mrb[24].mxu1 %vm255_vm4, %v1422_v53  ;;  %v4262_v53 = vld [vmem:[%s4618_s9 + $0x4] ss:$8 sps:$4 sm:$0xff]  }
 0x959   :  { %1667 = vmatpush1.bf16.msra.mxu1 %v4181_v42  ;;  %1698 = vmatprep.mubr.bf16.mxu1 %v3664_v32 }
 0x95a   :  { %1668 = vmatprep.subr.bf16.mxu1 %v4186_v50 }
 0x95b   :  { %v1509_v24 = vpop.permute.xlu1 %1508 }
 0x95c   :  { %3285 = vmatmul.mubr.msk.bf16.vlgmr.msra.gmra.mrb[28].mxu0 %vm255_vm4, %v1509_v24 }
 0x95d   :  { %1669 = vmatpush1.bf16.msra.mxu1 %v4193_v63  ;;  %1822 = vmatprep.mubr.bf16.mxu0 %v3664_v32 }
 0x95e   :  { %1670 = vmatprep.subr.bf16.mxu1 %v4200_v22  ;;  %1791 = vmatpush1.bf16.msra.mxu0 %v4241_v12 }
 0x95f   :  { %1792 = vmatprep.subr.bf16.mxu0 %v4251_v39 }
 0x961   :  { %1671 = vmatpush1.bf16.msra.mxu1 %v4207_v25 }
 0x962   :  { %1672 = vmatprep.subr.bf16.mxu1 %v4214_v26 }
 0x965   :  { %1673 = vmatpush1.bf16.msra.mxu1 %v4220_v27 }
 0x966   :  { %1877 = vmatprep.subr.bf16.mxu1 %v4262_v53 }
 0x968   :  { %3294 = vmatmul.mubr.msk.bf16.vlgmr.msra.gmra.mrb[28].mxu1 %vm255_vm4, %v1509_v24  ;;  %v4268_v24 = vld [vmem:[%s4617_s10 + $0x10] ss:$8 sps:$4 sm:$0xff]  }
 0x969   :  { %1909 = vmatprep.mubr.bf16.mxu1 %v3664_v32  ;;  %1878 = vmatpush1.bf16.msra.mxu1 %v4257_v48 }
 0x96a   :  { %1793 = vmatpush1.bf16.msra.mxu0 %v4268_v24 }
 0xa2b   :  { %v1500_v28 = vpop.f32.mrb[24].mxu1 }
 0xa2c   :  { %v1502_v29 = vpop.f32.mrb[25].mxu1 }
 0xa2d   :  { %v1504_v11 = vpop.f32.mrb[26].mxu1 }
 0xa2e   :  { %v1505_v13 = vpop.f32.mrb[27].mxu1  ;;  %v4286_v11 = vld [vmem:[%s4618_s9 + $0x10] ss:$8 sps:$4 sm:$0xff]  }
 0xa2f   :  { %v1587_v14 = vpop.f32.mrb[28].mxu0  ;;  %v4293_v13 = vld [vmem:[%s4617_s10 + $0x20] ss:$8 sps:$4 sm:$0xff]  }
 0xa30   :  { %v1588_v15 = vadd.f32 %v1587_v14, %v1500_v28  ;;  %v1589_v16 = vpop.f32.mrb[29].mxu0  ;;  %v4273_v28 = vld [vmem:[%s4618_s9 + $0x14] ss:$8 sps:$4 sm:$0xff]  }
 0xa31   :  { %v1590_v17 = vadd.f32 %v1589_v16, %v1502_v29  ;;  %v1591_v18 = vpop.f32.mrb[30].mxu0  ;;  %v4279_v29 = vld [vmem:[%s4617_s10 + $0x24] ss:$8 sps:$4 sm:$0xff]   ;;  %1879 = vmatprep.subr.bf16.mxu1 %v4273_v28  ;;  %v4299_v14 = vld [vmem:[%s4617_s10 + $0x34] ss:$8 sps:$4 sm:$0xff]  }
 0xa32   :  { %v1594_v19 = vadd.f32 %v1588_v15, %v4031_v51  ;;  %v1592_v20 = vpop.f32.mrb[31].mxu0  ;;  %1794 = vmatprep.subr.bf16.mxu0 %v4279_v29  ;;  %1880 = vmatpush1.bf16.msra.mxu1 %v4286_v11  ;;  %v4306_v15 = vld [vmem:[%s4617_s10 + $0x30] ss:$8 sps:$4 sm:$0xff]  }
 0xa33   :  { %v1595_v21 = vadd.f32 %v1590_v17, %v4035_v52  ;;  %1795 = vmatpush1.bf16.msra.mxu0 %v4293_v13  ;;  %v4323_v20 = vld [vmem:[%s4618_s9 + $0x20] ss:$8 sps:$4 sm:$0xff]  }
 0xa34   :  { %v1596_v23 = vmul.f32 0.5, %v1594_v19  ;;  %1796 = vmatprep.subr.bf16.mxu0 %v4299_v14  ;;  %v4318_v19 = vld [vmem:[%s4618_s9 + $0x24] ss:$8 sps:$4 sm:$0xff]  }
 0xa35   :  { %v1597_v30 = vmul.f32 %v1595_v21, %v3883_v59  ;;  %1881 = vmatprep.subr.bf16.mxu1 %v4318_v19  ;;  %v4331_v21 = vld [vmem:[%s4618_s9 + $0x34] ss:$8 sps:$4 sm:$0xff]  }
 0xa36   :  { %3600 = vtanh.f32 %v1596_v23  ;;  %1882 = vmatpush1.bf16.msra.mxu1 %v4323_v20 }
 0xa37   :  { %3602 = vtanh.f32 %v1597_v30  ;;  %1797 = vmatpush1.bf16.msra.mxu0 %v4306_v15  ;;  %v4336_v30 = vld [vmem:[%s4618_s9 + $0x30] ss:$8 sps:$4 sm:$0xff]   ;;  %1883 = vmatprep.subr.bf16.mxu1 %v4331_v21 }
 0xa38   :  { %1990 = vmatprep.subr.bf16.mxu0 %v4161_v9 }
 0xa3a   :  { %1884 = vmatpush1.bf16.msra.mxu1 %v4336_v30 }
 0xa3b   :  { %v1700_v31 = vpop.f32.mrb[28].mxu1  ;;  %2114 = vmatprep.subr.bf16.mxu1 %v4246_v60 }
 0xa3c   :  { %v1707_v33 = vadd.f32 %v1700_v31, %v3878_v54  ;;  %v1702_v34 = vpop.f32.mrb[29].mxu1 }
 0xa3d   :  { %v1708_v55 = vadd.f32 %v1702_v34, %v3880_v56  ;;  %v1704_v57 = vpop.f32.mrb[30].mxu1 }
 0xa3e   :  { %v1709_v58 = vmul.f32 0.5, %v1707_v33  ;;  %v1705_v61 = vpop.f32.mrb[31].mxu1 }
 0xa3f   :  { %v1710_v62 = vmul.f32 %v1708_v55, %v3883_v59 }
 0xa40   :  { %v3601_v1 = vpop.eup %3600  ;;  %3604 = vtanh.f32 %v1709_v58 }
 0xa41   :  { %v3603_v3 = vpop.eup %3602  ;;  %v1600_v47 = vmul.f32 0.5, %v3601_v1  ;;  %3606 = vtanh.f32 %v1710_v62 }
 0xa42   :  { %v1601_v5 = vmul.f32 %v3603_v3, %v3883_v59 }
 0xa43   :  { %v1602_v6 = vadd.f32 0.5, %v1600_v47 }
 0xa44   :  { %v1603_v45 = vadd.f32 %v1601_v5, %v3889_v4 }
 0xa45   :  { %v1604_v16 = vmul.f32 %v1602_v6, %v4165_v8 }
 0xa46   :  { %v1605_v37 = vmul.f32 %v1603_v45, %v1602_v6 }
 0xa48   :  { %1607 = vrot.lane.b32.xlu0 %v1605_v37, %s3666_s8 }
 0xa4a   :  { %v3605_v49 = vpop.eup %3604 }
 0xa4b   :  { %v3607_v7 = vpop.eup %3606  ;;  %v1713_v10 = vmul.f32 0.5, %v3605_v49 }
 0xa4c   :  { %v1714_v35 = vmul.f32 %v3607_v7, %v3883_v59 }
 0xa4d   :  { %v1715_v36 = vadd.f32 0.5, %v1713_v10 }
 0xa4e   :  { %v1716_v38 = vadd.f32 %v1714_v35, %v3889_v4 }
 0xa4f   :  { %v1717_v8 = vmul.f32 %v1715_v36, %v4169_v40 }
 0xa50   :  { %v1718_v41 = vmul.f32 %v1716_v38, %v1715_v36 }
 0xa52   :  { %1720 = vrot.lane.b32.xlu1 %v1718_v41, %s3666_s8 }
 0xaba   :  { %v1608_v17 = vpop.permute.xlu0 %1607 }
 0xabb   :  { %v4312_v18 = vadd.f32 %v1608_v17, %v1604_v16 }
 0xabd   :  { %3608 = vtanh.f32 %v4312_v18 }
 0xac4   :  { %v1721_v23 = vpop.permute.xlu1 %1720 }
 0xac5   :  { %v4338_v31 = vadd.f32 %v1721_v23, %v1717_v8 }
 0xac7   :  { %v3609_v33 = vpop.eup %3608  ;;  %3610 = vtanh.f32 %v4338_v31 }
 0xac8   :  { %v4344_v40 = vmul.f32 %v3609_v33, %v1603_v45 }
 0xaca   :  { %v1735_v34 = vpack.c.bf16 %v4344_v40, %v4344_v40 }
 0xacc   :  { %1745 = vrot.lane.b32.xlu0 %v1735_v34, %s3666_s8 }
 0xad1   :  { %v3611_v55 = vpop.eup %3610 }
 0xad2   :  { %v1725_v57 = vmul.f32 %v3611_v55, %v1716_v38 }
 0xad4   :  { %v1726_v58 = vpack.c.bf16 %v1725_v57, %v1725_v57 }
 0xad6   :  { %1832 = vrot.lane.b32.xlu1 %v1726_v58, %s3666_s8 }
 0xb3e   :  { %v1746_v61 = vpop.permute.xlu0 %1745 }
 0xb3f   :  { %3303 = vmatmul.mubr.msk.bf16.vlgmr.msra.gmra.mrb[32].mxu0 %vm255_vm4, %v1746_v61 }
 0xb40   :  { %1991 = vmatpush1.bf16.msra.mxu0 %v4181_v42  ;;  %2022 = vmatprep.mubr.bf16.mxu0 %v3664_v32 }
 0xb41   :  { %1992 = vmatprep.subr.bf16.mxu0 %v4186_v50 }
 0xb44   :  { %1993 = vmatpush1.bf16.msra.mxu0 %v4193_v63 }
 0xb45   :  { %1994 = vmatprep.subr.bf16.mxu0 %v4200_v22 }
 0xb48   :  { %1995 = vmatpush1.bf16.msra.mxu0 %v4207_v25  ;;  %v1833_v62 = vpop.permute.xlu1 %1832 }
 0xb49   :  { %3312 = vmatmul.mubr.msk.bf16.vlgmr.msra.gmra.mrb[32].mxu1 %vm255_vm4, %v1833_v62  ;;  %1996 = vmatprep.subr.bf16.mxu0 %v4214_v26 }
 0xb4a   :  { %2115 = vmatpush1.bf16.msra.mxu1 %v4241_v12  ;;  %2146 = vmatprep.mubr.bf16.mxu1 %v3664_v32 }
 0xb4b   :  { %2116 = vmatprep.subr.bf16.mxu1 %v4251_v39 }
 0xb4c   :  { %1997 = vmatpush1.bf16.msra.mxu0 %v4220_v27 }
 0xb4d   :  { %2201 = vmatprep.subr.bf16.mxu0 %v4262_v53 }
 0xb4e   :  { %2117 = vmatpush1.bf16.msra.mxu1 %v4268_v24 }
 0xb4f   :  { %3321 = vmatmul.mubr.msk.bf16.vlgmr.msra.gmra.mrb[36].mxu0 %vm255_vm4, %v1833_v62  ;;  %2118 = vmatprep.subr.bf16.mxu1 %v4279_v29 }
 0xb50   :  { %2202 = vmatpush1.bf16.msra.mxu0 %v4257_v48  ;;  %2233 = vmatprep.mubr.bf16.mxu0 %v3664_v32 }
 0xb51   :  { %2203 = vmatprep.subr.bf16.mxu0 %v4273_v28 }
 0xb52   :  { %2119 = vmatpush1.bf16.msra.mxu1 %v4293_v13 }
 0xb53   :  { %2120 = vmatprep.subr.bf16.mxu1 %v4299_v14 }
 0xb54   :  { %2204 = vmatpush1.bf16.msra.mxu0 %v4286_v11 }
 0xb55   :  { %2205 = vmatprep.subr.bf16.mxu0 %v4318_v19 }
 0xb56   :  { %2121 = vmatpush1.bf16.msra.mxu1 %v4306_v15 }
 0xb57   :  { %2314 = vmatprep.subr.bf16.mxu1 %v4161_v9 }
 0xb58   :  { %2206 = vmatpush1.bf16.msra.mxu0 %v4323_v20 }
 0xb59   :  { %2207 = vmatprep.subr.bf16.mxu0 %v4331_v21 }
 0xb5c   :  { %2208 = vmatpush1.bf16.msra.mxu0 %v4336_v30 }
 0xb5d   :  { %2438 = vmatprep.subr.bf16.mxu0 %v4246_v60 }
 0xc12   :  { %v1824_v1 = vpop.f32.mrb[32].mxu0 }
 0xc13   :  { %v1826_v3 = vpop.f32.mrb[33].mxu0 }
 0xc14   :  { %v1828_v47 = vpop.f32.mrb[34].mxu0 }
 0xc15   :  { %v1829_v5 = vpop.f32.mrb[35].mxu0 }
 0xc1c   :  { %v1911_v6 = vpop.f32.mrb[32].mxu1 }
 0xc1d   :  { %v1912_v45 = vadd.f32 %v1911_v6, %v1824_v1  ;;  %v1913_v37 = vpop.f32.mrb[33].mxu1 }
 0xc1e   :  { %v1914_v49 = vadd.f32 %v1913_v37, %v1826_v3  ;;  %v1915_v7 = vpop.f32.mrb[34].mxu1 }
 0xc1f   :  { %v1918_v10 = vadd.f32 %v1912_v45, %v4031_v51  ;;  %v1916_v35 = vpop.f32.mrb[35].mxu1 }
 0xc20   :  { %v1919_v36 = vadd.f32 %v1914_v49, %v4035_v52 }
 0xc21   :  { %v1920_v38 = vmul.f32 0.5, %v1918_v10 }
 0xc22   :  { %v1921_v41 = vmul.f32 %v1919_v36, %v3883_v59  ;;  %v2024_v16 = vpop.f32.mrb[36].mxu0 }
 0xc23   :  { %3612 = vtanh.f32 %v1920_v38  ;;  %v2031_v17 = vadd.f32 %v2024_v16, %v3878_v54  ;;  %v2026_v8 = vpop.f32.mrb[37].mxu0 }
 0xc24   :  { %3614 = vtanh.f32 %v1921_v41  ;;  %v2032_v23 = vadd.f32 %v2026_v8, %v3880_v56  ;;  %v2028_v33 = vpop.f32.mrb[38].mxu0 }
 0xc25   :  { %v2033_v34 = vmul.f32 0.5, %v2031_v17  ;;  %v2029_v55 = vpop.f32.mrb[39].mxu0 }
 0xc26   :  { %v2034_v57 = vmul.f32 %v2032_v23, %v3883_v59 }
 0xc27   :  { %3616 = vtanh.f32 %v2033_v34 }
 0xc28   :  { %3618 = vtanh.f32 %v2034_v57 }
 0xc2d   :  { %v3613_v58 = vpop.eup %3612 }
 0xc2e   :  { %v3615_v61 = vpop.eup %3614  ;;  %v1924_v62 = vmul.f32 0.5, %v3613_v58 }
 0xc2f   :  { %v1925_v1 = vmul.f32 %v3615_v61, %v3883_v59 }
 0xc30   :  { %v1926_v3 = vadd.f32 0.5, %v1924_v62 }
 0xc31   :  { %v3617_v47 = vpop.eup %3616  ;;  %v1927_v5 = vadd.f32 %v1925_v1, %v3889_v4 }
 0xc32   :  { %v3619_v6 = vpop.eup %3618  ;;  %v2037_v45 = vmul.f32 0.5, %v3617_v47  ;;  %v1928_v36 = vmul.f32 %v1926_v3, %v4312_v18 }
 0xc33   :  { %v1929_v37 = vmul.f32 %v1927_v5, %v1926_v3  ;;  %v2038_v49 = vmul.f32 %v3619_v6, %v3883_v59 }
 0xc34   :  { %v2039_v7 = vadd.f32 0.5, %v2037_v45 }
 0xc35   :  { %1931 = vrot.lane.b32.xlu0 %v1929_v37, %s3666_s8  ;;  %v2040_v10 = vadd.f32 %v2038_v49, %v3889_v4 }
 0xc36   :  { %v2041_v16 = vmul.f32 %v2039_v7, %v4338_v31 }
 0xc37   :  { %v2042_v35 = vmul.f32 %v2040_v10, %v2039_v7 }
 0xc39   :  { %2044 = vrot.lane.b32.xlu1 %v2042_v35, %s3666_s8 }
 0xca7   :  { %v1932_v38 = vpop.permute.xlu0 %1931 }
 0xca8   :  { %v4393_v41 = vadd.f32 %v1932_v38, %v1928_v36 }
 0xcaa   :  { %3620 = vtanh.f32 %v4393_v41 }
 0xcab   :  { %v2045_v17 = vpop.permute.xlu1 %2044 }
 0xcac   :  { %v4397_v8 = vadd.f32 %v2045_v17, %v2041_v16 }
 0xcae   :  { %3622 = vtanh.f32 %v4397_v8 }
 0xcb4   :  { %v3621_v23 = vpop.eup %3620 }
 0xcb5   :  { %v4400_v33 = vmul.f32 %v3621_v23, %v1927_v5 }
 0xcb7   :  { %v2059_v34 = vpack.c.bf16 %v4400_v33, %v4400_v33 }
 0xcb8   :  { %v3623_v55 = vpop.eup %3622 }
 0xcb9   :  { %2069 = vrot.lane.b32.xlu0 %v2059_v34, %s3666_s8  ;;  %v2049_v18 = vmul.f32 %v3623_v55, %v2040_v10 }
 0xcbb   :  { %v2050_v57 = vpack.c.bf16 %v2049_v18, %v2049_v18 }
 0xcbd   :  { %2156 = vrot.lane.b32.xlu1 %v2050_v57, %s3666_s8 }
 0xd2b   :  { %v2070_v58 = vpop.permute.xlu0 %2069 }
 0xd2c   :  { %3330 = vmatmul.mubr.msk.bf16.vlgmr.msra.gmra.mrb[36].mxu1 %vm255_vm4, %v2070_v58 }
 0xd2d   :  { %2315 = vmatpush1.bf16.msra.mxu1 %v4181_v42  ;;  %2346 = vmatprep.mubr.bf16.mxu1 %v3664_v32 }
 0xd2e   :  { %2316 = vmatprep.subr.bf16.mxu1 %v4186_v50 }
 0xd2f   :  { %v2157_v31 = vpop.permute.xlu1 %2156 }
 0xd30   :  { %3339 = vmatmul.mubr.msk.bf16.vlgmr.msra.gmra.mrb[40].mxu0 %vm255_vm4, %v2157_v31 }
 0xd31   :  { %2317 = vmatpush1.bf16.msra.mxu1 %v4193_v63  ;;  %2439 = vmatpush1.bf16.msra.mxu0 %v4241_v12 }
 0xd32   :  { %2318 = vmatprep.subr.bf16.mxu1 %v4200_v22  ;;  %2440 = vmatprep.subr.bf16.mxu0 %v4251_v39 }
 0xd33   :  { %2470 = vmatprep.mubr.bf16.mxu0 %v3664_v32 }
 0xd35   :  { %2319 = vmatpush1.bf16.msra.mxu1 %v4207_v25  ;;  %2441 = vmatpush1.bf16.msra.mxu0 %v4268_v24 }
 0xd36   :  { %2320 = vmatprep.subr.bf16.mxu1 %v4214_v26  ;;  %2442 = vmatprep.subr.bf16.mxu0 %v4279_v29 }
 0xd39   :  { %2321 = vmatpush1.bf16.msra.mxu1 %v4220_v27  ;;  %2443 = vmatpush1.bf16.msra.mxu0 %v4293_v13 }
 0xd3a   :  { %2525 = vmatprep.subr.bf16.mxu1 %v4262_v53  ;;  %2444 = vmatprep.subr.bf16.mxu0 %v4299_v14 }
 0xd3c   :  { %3348 = vmatmul.mubr.msk.bf16.vlgmr.msra.gmra.mrb[40].mxu1 %vm255_vm4, %v2157_v31 }
 0xd3d   :  { %2526 = vmatpush1.bf16.msra.mxu1 %v4257_v48  ;;  %2445 = vmatpush1.bf16.msra.mxu0 %v4306_v15 }
 0xd3e   :  { %2527 = vmatprep.subr.bf16.mxu1 %v4273_v28  ;;  %2638 = vmatprep.subr.bf16.mxu0 %v4161_v9 }
 0xd3f   :  { %2557 = vmatprep.mubr.bf16.mxu1 %v3664_v32 }
 0xd41   :  { %2528 = vmatpush1.bf16.msra.mxu1 %v4286_v11 }
 0xd42   :  { %2529 = vmatprep.subr.bf16.mxu1 %v4318_v19 }
 0xd45   :  { %2530 = vmatpush1.bf16.msra.mxu1 %v4323_v20 }
 0xd46   :  { %2531 = vmatprep.subr.bf16.mxu1 %v4331_v21 }
 0xd49   :  { %2532 = vmatpush1.bf16.msra.mxu1 %v4336_v30 }
 0xd4a   :  { %2762 = vmatprep.subr.bf16.mxu1 %v4246_v60 }
 0xdff   :  { %v2148_v61 = vpop.f32.mrb[36].mxu1 }
 0xe00   :  { %v2150_v62 = vpop.f32.mrb[37].mxu1 }
 0xe01   :  { %v2152_v1 = vpop.f32.mrb[38].mxu1 }
 0xe02   :  { %v2153_v3 = vpop.f32.mrb[39].mxu1 }
 0xe03   :  { %v2235_v47 = vpop.f32.mrb[40].mxu0 }
 0xe04   :  { %v2236_v9 = vadd.f32 %v2235_v47, %v2148_v61  ;;  %v2237_v5 = vpop.f32.mrb[41].mxu0 }
 0xe05   :  { %v2238_v6 = vadd.f32 %v2237_v5, %v2150_v62  ;;  %v2239_v45 = vpop.f32.mrb[42].mxu0 }
 0xe06   :  { %v2242_v37 = vadd.f32 %v2236_v9, %v4031_v51  ;;  %v2240_v49 = vpop.f32.mrb[43].mxu0 }
 0xe07   :  { %v2243_v7 = vadd.f32 %v2238_v6, %v4035_v52 }
 0xe08   :  { %v2244_v10 = vmul.f32 0.5, %v2242_v37 }
 0xe09   :  { %v2245_v35 = vmul.f32 %v2243_v7, %v3883_v59 }
 0xe0a   :  { %3624 = vtanh.f32 %v2244_v10 }
 0xe0b   :  { %3626 = vtanh.f32 %v2245_v35 }
 0xe0f   :  { %v2348_v60 = vpop.f32.mrb[40].mxu1 }
 0xe10   :  { %v2355_v36 = vadd.f32 %v2348_v60, %v3878_v54  ;;  %v2350_v38 = vpop.f32.mrb[41].mxu1 }
 0xe11   :  { %v2356_v16 = vadd.f32 %v2350_v38, %v3880_v56  ;;  %v2352_v17 = vpop.f32.mrb[42].mxu1 }
 0xe12   :  { %v2357_v23 = vmul.f32 0.5, %v2355_v36  ;;  %v2353_v34 = vpop.f32.mrb[43].mxu1 }
 0xe13   :  { %v2358_v55 = vmul.f32 %v2356_v16, %v3883_v59 }
 0xe14   :  { %v3625_v18 = vpop.eup %3624  ;;  %3628 = vtanh.f32 %v2357_v23 }
 0xe15   :  { %v3627_v57 = vpop.eup %3626  ;;  %v2248_v58 = vmul.f32 0.5, %v3625_v18  ;;  %3630 = vtanh.f32 %v2358_v55 }
 0xe16   :  { %v2249_v31 = vmul.f32 %v3627_v57, %v3883_v59 }
 0xe17   :  { %v2250_v61 = vadd.f32 0.5, %v2248_v58 }
 0xe18   :  { %v2251_v62 = vadd.f32 %v2249_v31, %v3889_v4 }
 0xe19   :  { %v2252_v49 = vmul.f32 %v2250_v61, %v4393_v41 }
 0xe1a   :  { %v2253_v1 = vmul.f32 %v2251_v62, %v2250_v61 }
 0xe1c   :  { %2255 = vrot.lane.b32.xlu0 %v2253_v1, %s3666_s8 }
 0xe1e   :  { %v3629_v3 = vpop.eup %3628 }
 0xe1f   :  { %v3631_v47 = vpop.eup %3630  ;;  %v2361_v9 = vmul.f32 0.5, %v3629_v3 }
 0xe20   :  { %v2362_v5 = vmul.f32 %v3631_v47, %v3883_v59 }
 0xe21   :  { %v2363_v6 = vadd.f32 0.5, %v2361_v9 }
 0xe22   :  { %v2364_v45 = vadd.f32 %v2362_v5, %v3889_v4 }
 0xe23   :  { %v2365_v35 = vmul.f32 %v2363_v6, %v4397_v8 }
 0xe24   :  { %v2366_v37 = vmul.f32 %v2364_v45, %v2363_v6 }
 0xe26   :  { %2368 = vrot.lane.b32.xlu1 %v2366_v37, %s3666_s8 }
 0xe8e   :  { %v2256_v7 = vpop.permute.xlu0 %2255 }
 0xe8f   :  { %v4449_v10 = vadd.f32 %v2256_v7, %v2252_v49 }
 0xe91   :  { %3632 = vtanh.f32 %v4449_v10 }
 0xe98   :  { %v2369_v60 = vpop.permute.xlu1 %2368 }
 0xe99   :  { %v4453_v36 = vadd.f32 %v2369_v60, %v2365_v35 }
 0xe9b   :  { %v3633_v38 = vpop.eup %3632  ;;  %3634 = vtanh.f32 %v4453_v36 }
 0xe9c   :  { %v4456_v16 = vmul.f32 %v3633_v38, %v2251_v62 }
 0xe9e   :  { %v2383_v17 = vpack.c.bf16 %v4456_v16, %v4456_v16 }
 0xea0   :  { %2393 = vrot.lane.b32.xlu0 %v2383_v17, %s3666_s8 }
 0xea5   :  { %v3635_v41 = vpop.eup %3634 }
 0xea6   :  { %v2373_v23 = vmul.f32 %v3635_v41, %v2364_v45 }
 0xea8   :  { %v2374_v34 = vpack.c.bf16 %v2373_v23, %v2373_v23 }
 0xeaa   :  { %2480 = vrot.lane.b32.xlu1 %v2374_v34, %s3666_s8 }
 0xf12   :  { %v2394_v55 = vpop.permute.xlu0 %2393 }
 0xf13   :  { %3357 = vmatmul.mubr.msk.bf16.vlgmr.msra.gmra.mrb[44].mxu0 %vm255_vm4, %v2394_v55 }
 0xf14   :  { %2639 = vmatpush1.bf16.msra.mxu0 %v4181_v42  ;;  %2670 = vmatprep.mubr.bf16.mxu0 %v3664_v32 }
 0xf15   :  { %2640 = vmatprep.subr.bf16.mxu0 %v4186_v50 }
 0xf18   :  { %2641 = vmatpush1.bf16.msra.mxu0 %v4193_v63 }
 0xf19   :  { %2642 = vmatprep.subr.bf16.mxu0 %v4200_v22 }
 0xf1c   :  { %2643 = vmatpush1.bf16.msra.mxu0 %v4207_v25  ;;  %v2481_v8 = vpop.permute.xlu1 %2480 }
 0xf1d   :  { %3366 = vmatmul.mubr.msk.bf16.vlgmr.msra.gmra.mrb[44].mxu1 %vm255_vm4, %v2481_v8  ;;  %2644 = vmatprep.subr.bf16.mxu0 %v4214_v26 }
 0xf1e   :  { %2763 = vmatpush1.bf16.msra.mxu1 %v4241_v12  ;;  %2794 = vmatprep.mubr.bf16.mxu1 %v3664_v32 }
 0xf1f   :  { %2764 = vmatprep.subr.bf16.mxu1 %v4251_v39 }
 0xf20   :  { %2645 = vmatpush1.bf16.msra.mxu0 %v4220_v27 }
 0xf21   :  { %2849 = vmatprep.subr.bf16.mxu0 %v4262_v53 }
 0xf22   :  { %2765 = vmatpush1.bf16.msra.mxu1 %v4268_v24 }
 0xf23   :  { %3375 = vmatmul.mubr.msk.bf16.vlgmr.msra.gmra.mrb[48].mxu0 %vm255_vm4, %v2481_v8  ;;  %2766 = vmatprep.subr.bf16.mxu1 %v4279_v29 }
 0xf24   :  { %2850 = vmatpush1.bf16.msra.mxu0 %v4257_v48  ;;  %2881 = vmatprep.mubr.bf16.mxu0 %v3664_v32 }
 0xf25   :  { %2851 = vmatprep.subr.bf16.mxu0 %v4273_v28 }
 0xf26   :  { %2767 = vmatpush1.bf16.msra.mxu1 %v4293_v13 }
 0xf27   :  { %2768 = vmatprep.subr.bf16.mxu1 %v4299_v14 }
 0xf28   :  { %2852 = vmatpush1.bf16.msra.mxu0 %v4286_v11 }
 0xf29   :  { %2853 = vmatprep.subr.bf16.mxu0 %v4318_v19 }
 0xf2a   :  { %2769 = vmatpush1.bf16.msra.mxu1 %v4306_v15 }
 0xf2b   :  { %3436 = vmatprep.subr.bf16.mxu1 %v3662_v0 }
 0xf2c   :  { %2854 = vmatpush1.bf16.msra.mxu0 %v4323_v20 }
 0xf2d   :  { %2855 = vmatprep.subr.bf16.mxu0 %v4331_v21 }
 0xf30   :  { %2856 = vmatpush1.bf16.msra.mxu0 %v4336_v30 }
 0xf31   :  { %3448 = vmatprep.subr.bf16.mxu0 %v3662_v0 }
 0xfe6   :  { %v2472_v32 = vpop.f32.mrb[44].mxu0 }
 0xfe7   :  { %v2474_v42 = vpop.f32.mrb[45].mxu0 }
 0xfe8   :  { %v2476_v50 = vpop.f32.mrb[46].mxu0 }
 0xfe9   :  { %v2477_v63 = vpop.f32.mrb[47].mxu0 }
 0xff0   :  { %v2559_v22 = vpop.f32.mrb[44].mxu1 }
 0xff1   :  { %v2560_v25 = vadd.f32 %v2559_v22, %v2472_v32  ;;  %v2561_v26 = vpop.f32.mrb[45].mxu1 }
 0xff2   :  { %v2562_v27 = vadd.f32 %v2561_v26, %v2474_v42  ;;  %v2563_v12 = vpop.f32.mrb[46].mxu1 }
 0xff3   :  { %v2566_v39 = vadd.f32 %v2560_v25, %v4031_v51  ;;  %v2564_v48 = vpop.f32.mrb[47].mxu1 }
 0xff4   :  { %v2567_v53 = vadd.f32 %v2562_v27, %v4035_v52 }
 0xff5   :  { %v2568_v24 = vmul.f32 0.5, %v2566_v39 }
 0xff6   :  { %v2569_v28 = vmul.f32 %v2567_v53, %v3883_v59  ;;  %v2672_v29 = vpop.f32.mrb[48].mxu0 }
 0xff7   :  { %3636 = vtanh.f32 %v2568_v24  ;;  %v2679_v11 = vadd.f32 %v2672_v29, %v3878_v54  ;;  %v2674_v13 = vpop.f32.mrb[49].mxu0 }
 0xff8   :  { %3638 = vtanh.f32 %v2569_v28  ;;  %v2680_v14 = vadd.f32 %v2674_v13, %v3880_v56  ;;  %v2676_v15 = vpop.f32.mrb[50].mxu0 }
 0xff9   :  { %v2681_v19 = vmul.f32 0.5, %v2679_v11  ;;  %v2677_v20 = vpop.f32.mrb[51].mxu0 }
 0xffa   :  { %v2682_v21 = vmul.f32 %v2680_v14, %v3883_v59  ;;  %v3553_v20 = vld [vmem:[%s4620_s12 + $0x10] sm:$0xff]  }
 0xffb   :  { %3640 = vtanh.f32 %v2681_v19 }
 0xffc   :  { %3642 = vtanh.f32 %v2682_v21 }
0x1001   :  { %v3637_v30 = vpop.eup %3636 }
0x1002   :  { %v3639_v18 = vpop.eup %3638  ;;  %v2572_v57 = vmul.f32 0.5, %v3637_v30 }
0x1003   :  { %v2573_v58 = vmul.f32 %v3639_v18, %v3883_v59 }
0x1004   :  { %v2574_v31 = vadd.f32 0.5, %v2572_v57 }
0x1005   :  { %v3641_v61 = vpop.eup %3640  ;;  %v2575_v54 = vadd.f32 %v2573_v58, %v3889_v4  ;;  %v3555_v58 = vld [vmem:[%s4621_s14] sm:$0xff]  }
0x1006   :  { %v3643_v62 = vpop.eup %3642  ;;  %v2685_v1 = vmul.f32 0.5, %v3641_v61  ;;  %v2576_v6 = vmul.f32 %v2574_v31, %v4449_v10 }
0x1007   :  { %v2577_v3 = vmul.f32 %v2575_v54, %v2574_v31  ;;  %v2686_v56 = vmul.f32 %v3643_v62, %v3883_v59 }
0x1008   :  { %v2687_v47 = vadd.f32 0.5, %v2685_v1  ;;  %v3556_v1 = vld [vmem:[%s4621_s14 + $0x8] sm:$0xff]  }
0x1009   :  { %2579 = vrot.lane.b32.xlu0 %v2577_v3, %s3666_s8  ;;  %v2688_v9 = vadd.f32 %v2686_v56, %v3889_v4  ;;  %v3557_v3 = vld [vmem:[%s4621_s14 + $0x10] sm:$0xff]   ;;  %v3394_v56 = vld [vmem:[%s4622_s13] ss:$0 sm:$0xff] }
0x100a   :  { %v2689_v49 = vmul.f32 %v2687_v47, %v4453_v36 }
0x100b   :  { %v2690_v5 = vmul.f32 %v2688_v9, %v2687_v47 }
0x100d   :  { %2692 = vrot.lane.b32.xlu1 %v2690_v5, %s3666_s8 }
0x107b   :  { %v2580_v45 = vpop.permute.xlu0 %2579 }
0x107c   :  { %v4505_v37 = vadd.f32 %v2580_v45, %v2576_v6 }
0x107e   :  { %3644 = vtanh.f32 %v4505_v37 }
0x107f   :  { %v2693_v7 = vpop.permute.xlu1 %2692 }
0x1080   :  { %v2695_v35 = vadd.f32 %v2693_v7, %v2689_v49 }
0x1082   :  { %3646 = vtanh.f32 %v2695_v35 }
0x1088   :  { %v3645_v60 = vpop.eup %3644 }
0x1089   :  { %v2584_v38 = vmul.f32 %v3645_v60, %v2575_v54 }
0x108b   :  { %v2707_v17 = vpack.c.bf16 %v2584_v38, %v2584_v38 }
0x108c   :  { %v3647_v41 = vpop.eup %3646 }
0x108d   :  { %2717 = vrot.lane.b32.xlu0 %v2707_v17, %s3666_s8  ;;  %v2697_v23 = vmul.f32 %v3647_v41, %v2688_v9 }
0x108f   :  { %v2698_v34 = vpack.c.bf16 %v2697_v23, %v2697_v23 }
0x1091   :  { %2804 = vrot.lane.b32.xlu1 %v2698_v34, %s3666_s8 }
0x1095   :  { %641 = vrot.lane.b32.xlu1 %v4056_v2, %s3666_s8 }
0x1099   :  { %1290 = vrot.lane.b32.xlu1 %v4172_v43, %s3666_s8 }
0x109d   :  { %1938 = vrot.lane.b32.xlu1 %v4400_v33, %s3666_s8 }
0x10a1   :  { %2586 = vrot.lane.b32.xlu1 %v2584_v38, %s3666_s8 }
0x10ff   :  { %v2718_v10 = vpop.permute.xlu0 %2717 }
0x1100   :  { %3384 = vmatmul.mubr.msk.bf16.vlgmr.msra.gmra.mrb[48].mxu1 %vm255_vm4, %v2718_v10 }
0x1101   :  { %3444 = vmatprep.mubr.msk.bf16.mxu1 %vm3663_vm0, %v3662_v0 }
0x1103   :  { %v2805_v36 = vpop.permute.xlu1 %2804 }
0x1104   :  { %3393 = vmatmul.mubr.msk.bf16.vlgmr.msra.gmra.mrb[52].mxu0 %vm255_vm4, %v2805_v36 }
0x1105   :  { %3454 = vmatprep.mubr.msk.bf16.mxu0 %vm3663_vm0, %v3662_v0  ;;  %3449 = vmatpush3.bf16.msra.mxu0 %v3555_v58 }
0x1106   :  { %3450 = vmatprep.subr.bf16.mxu0 %v3662_v0 }
0x1107   :  { %v642_v2 = vpop.permute.xlu1 %641 }
0x1108   :  { %645 = vst.msk [vmem:[#allocation2] sm:$0x3] %vm644_vm6, %v642_v2 }
0x1109   :  { %3451 = vmatpush3.bf16.msra.mxu0 %v3556_v1 }
0x110a   :  { %3452 = vmatprep.subr.bf16.mxu0 %v3662_v0 }
0x110b   :  { %v1291_v43 = vpop.permute.xlu1 %1290 }
0x110c   :  { %1293 = vst.msk [vmem:[#allocation2 + $0x4] sm:$0x3] %vm644_vm6, %v1291_v43 }
0x110d   :  { %3453 = vmatpush3.bf16.msra.mxu0 %v3557_v3 }
0x110f   :  { %v1939_v33 = vpop.permute.xlu1 %1938 }
0x1110   :  { %1941 = vst.msk [vmem:[#allocation2 + $0x8] sm:$0x3] %vm644_vm6, %v1939_v33 }
0x1113   :  { %v2587_v55 = vpop.permute.xlu1 %2586 }
0x1114   :  { %2589 = vst.msk [vmem:[#allocation2 + $0xc] sm:$0x3] %vm644_vm6, %v2587_v55 }
0x11d3   :  { %v2796_v8 = vpop.f32.mrb[48].mxu1 }
0x11d4   :  { %v2798_v32 = vpop.f32.mrb[49].mxu1 }
0x11d5   :  { %v2800_v42 = vpop.f32.mrb[50].mxu1 }
0x11d6   :  { %v2801_v50 = vpop.f32.mrb[51].mxu1 }
0x11d7   :  { %v2883_v63 = vpop.f32.mrb[52].mxu0 }
0x11d8   :  { %v2884_v22 = vadd.f32 %v2883_v63, %v2796_v8  ;;  %v2885_v25 = vpop.f32.mrb[53].mxu0 }
0x11d9   :  { %v2886_v26 = vadd.f32 %v2885_v25, %v2798_v32  ;;  %v2887_v27 = vpop.f32.mrb[54].mxu0 }
0x11da   :  { %v2890_v12 = vadd.f32 %v2884_v22, %v4031_v51  ;;  %v2888_v39 = vpop.f32.mrb[55].mxu0  ;;  %v3551_v51 = vld [vmem:[%s4620_s12] sm:$0xff]  }
0x11db   :  { %v2891_v48 = vadd.f32 %v2886_v26, %v4035_v52  ;;  %v3552_v52 = vld [vmem:[%s4620_s12 + $0x8] sm:$0xff]   ;;  %3437 = vmatpush3.bf16.msra.mxu1 %v3551_v51 }
0x11dc   :  { %v2892_v53 = vmul.f32 0.5, %v2890_v12  ;;  %3438 = vmatprep.subr.bf16.mxu1 %v3662_v0 }
0x11dd   :  { %v2893_v24 = vmul.f32 %v2891_v48, %v3883_v59 }
0x11de   :  { %3648 = vtanh.f32 %v2892_v53 }
0x11df   :  { %3650 = vtanh.f32 %v2893_v24  ;;  %3439 = vmatpush3.bf16.msra.mxu1 %v3552_v52  ;;  %v3108_v24 = vld [vmem:[%s4624_s1] sm:$0xff] }
0x11e0   :  { %3440 = vmatprep.subr.bf16.mxu1 %v3662_v0 }
0x11e3   :  { %3441 = vmatpush3.bf16.msra.mxu1 %v3553_v20 }
0x11e4   :  { %3442 = vmatprep.subr.bf16.mxu1 %v3662_v0  ;;  %v3400_v0 = vld [vmem:[%s4623_s15] ss:$0 sm:$0xff] }
0x11e8   :  { %v3649_v28 = vpop.eup %3648 }
0x11e9   :  { %v3651_v29 = vpop.eup %3650  ;;  %v2896_v11 = vmul.f32 0.5, %v3649_v28 }
0x11ea   :  { %v2897_v13 = vmul.f32 %v3651_v29, %v3883_v59 }
0x11eb   :  { %v2898_v14 = vadd.f32 0.5, %v2896_v11  ;;  %v3109_v11 = vld [vmem:[%s4624_s1 + $0x8] sm:$0xff] }
0x11ec   :  { %v2899_v15 = vadd.f32 %v2897_v13, %v3889_v4 }
0x11ed   :  { %v2900_v59 = vmul.f32 %v2898_v14, %v4505_v37 }
0x11ee   :  { %v2901_v19 = vmul.f32 %v2899_v15, %v2898_v14 }
0x11f0   :  { %2903 = vrot.lane.b32.xlu0 %v2901_v19, %s3666_s8 }
0x11f4   :  { %966 = vrot.lane.b32.xlu0 %v4112_v44, %s3666_s8 }
0x11f8   :  { %1614 = vrot.lane.b32.xlu0 %v4344_v40, %s3666_s8  ;;  %v3554_v40 = vld [vmem:[%s4620_s12 + $0x18] sm:$0xff]  }
0x11f9   :  { %3443 = vmatpush3.bf16.msra.mxu1 %v3554_v40 }
0x11fc   :  { %2262 = vrot.lane.b32.xlu0 %v4456_v16, %s3666_s8 }
0x1262   :  { %v2904_v4 = vpop.permute.xlu0 %2903 }
0x1263   :  { %v2906_v44 = vadd.f32 %v2904_v4, %v2900_v59 }
0x1265   :  { %3652 = vtanh.f32 %v2906_v44 }
0x1266   :  { %v967_v21 = vpop.permute.xlu0 %966 }
0x1267   :  { %969 = vst.msk [vmem:[#allocation2 + $0x2] sm:$0x3] %vm644_vm6, %v967_v21 }
0x126a   :  { %v1615_v16 = vpop.permute.xlu0 %1614 }
0x126b   :  { %1617 = vst.msk [vmem:[#allocation2 + $0x6] sm:$0x3] %vm644_vm6, %v1615_v16 }
0x126e   :  { %v2263_v30 = vpop.permute.xlu0 %2262 }
0x126f   :  { %v3653_v18 = vpop.eup %3652  ;;  %2265 = vst.msk [vmem:[#allocation2 + $0xa] sm:$0x3] %vm644_vm6, %v2263_v30 }
0x1270   :  { %v2908_v57 = vmul.f32 %v3653_v18, %v2899_v15 }
0x1272   :  { %2910 = vrot.lane.b32.xlu0 %v2908_v57, %s3666_s8  ;;  %v2914_v61 = vld [vmem:[#allocation2] sm:$0xff] }
0x12e4   :  { %v2911_v31 = vpop.permute.xlu0 %2910 }
0x12e5   :  { %2913 = vst.msk [vmem:[#allocation2 + $0xe] sm:$0x3] %vm644_vm6, %v2911_v31 }
0x12ec   :  { %v2915_v54 = vld [vmem:[#allocation2 + $0x8] sm:$0xff] }
0x12ed   :  { %v2916_v62 = vpack.c.bf16 %v2915_v54, %v2914_v61 }
0x12ef   :  { %3445 = vmatmul.mubr.msk.bf16.vlgmr.msra.gmra.mrb[52].mxu1 %vm255_vm4, %v2916_v62 }
0x13c2   :  { %v2993_v47 = vpop.f32.mrb[52].mxu1 }
0x13c3   :  { %v2994_v9 = vadd.f32 %v3394_v56, %v2993_v47  ;;  %v3446_v5 = vpop.f32.mrb[53].mxu1 }
0x13c4   :  { %v2996_v6 = vpop.f32.mrb[54].mxu1 }
0x13c5   :  { %v2997_v45 = vadd.f32 %v3394_v56, %v2996_v6  ;;  %v3447_v37 = vpop.f32.mrb[55].mxu1  ;;  %v3000_v49 = vmax.f32 %v2994_v9, 0.0 }
0x13c7   :  { %v3001_v7 = vmax.f32 %v2997_v45, 0.0 }
0x13c9   :  { %v3002_v35 = vpack.c.bf16 %v3001_v7, %v3000_v49 }
0x13cb   :  { %3455 = vmatmul.mubr.msk.bf16.vlgmr.msra.gmra.mrb[56].mxu0 %vm3034_vm7, %v3002_v35 }
0x149e   :  { %v3072_v60 = vpop.f32.mrb[56].mxu0 }
0x149f   :  { %v3073_v38 = vadd.f32 %v3400_v0, %v3072_v60  ;;  %v3456_v17 = vpop.f32.mrb[57].mxu0 }
0x14a0   :  { %v3075_v41 = vpop.f32.mrb[58].mxu0 }
0x14a1   :  { %v3076_v23 = vadd.f32 %v3400_v0, %v3075_v41  ;;  %v3457_v34 = vpop.f32.mrb[59].mxu0  ;;  %v3080_v10 = vsel %vm3079_vm8, %v3073_v38, -inf }
0x14a2   :  { %3081 = vmax.xlane.f32.xlu1 %v3080_v10 }
0x14a3   :  { %v3083_v36 = vsel %vm3079_vm8, %v3076_v23, -inf }
0x14a4   :  { %3084 = vmax.xlane.f32.xlu0 %v3083_v36 }
0x152f   :  { %v3082_v2 = vpop.xlane.xlu1 %3081 }
0x1530   :  { %v3086_v43 = vsub.f32 %v3073_v38, %v3082_v2 }
0x1531   :  { %v3085_v33 = vpop.xlane.xlu0 %3084 }
0x1532   :  { %v3088_v55 = vmul.f32 1.442695, %v3086_v43  ;;  %v3087_v8 = vsub.f32 %v3076_v23, %v3085_v33 }
0x1534   :  { %3654 = vpow2.f32 %v3088_v55  ;;  %v3090_v32 = vmul.f32 1.442695, %v3087_v8 }
0x1536   :  { %3656 = vpow2.f32 %v3090_v32 }
0x153e   :  { %v3655_v42 = vpop.eup %3654 }
0x153f   :  { %v3092_v50 = vsel %vm3079_vm8, %v3655_v42, 0.0 }
0x1540   :  { %v3657_v63 = vpop.eup %3656  ;;  %3093 = vadd.xlane.f32.xlu0 %v3092_v50 }
0x1541   :  { %v3095_v22 = vsel %vm3079_vm8, %v3657_v63, 0.0 }
0x1542   :  { %3096 = vadd.xlane.f32.xlu1 %v3095_v22 }
0x15cd   :  { %v3094_v25 = vpop.xlane.xlu0 %3093 }
0x15ce   :  { %3658 = vlog2.f32 %v3094_v25 }
0x15cf   :  { %v3097_v26 = vpop.xlane.xlu1 %3096 }
0x15d0   :  { %3660 = vlog2.f32 %v3097_v26 }
0x15d8   :  { %v3659_v27 = vpop.eup %3658 }
0x15d9   :  { %v3099_v12 = vmul.f32 0.6931472, %v3659_v27 }
0x15da   :  { %v3661_v39 = vpop.eup %3660 }
0x15db   :  { %v3102_v48 = vadd.f32 %v3099_v12, %v3082_v2  ;;  %v3101_v53 = vmul.f32 0.6931472, %v3661_v39 }
0x15dd   :  { %v3103_v28 = vadd.f32 %v3101_v53, %v3085_v33  ;;  %v3104_v29 = vsub.f32 %v3073_v38, %v3102_v48 }
0x15df   :  { %v3110_v13 = vadd.f32 %v3108_v24, %v3104_v29  ;;  %3106 = vst.msk [vmem:[%s4625_s16] sm:$0xff] %vm3079_vm8, %v3104_v29  ;;  %v3105_v14 = vsub.f32 %v3076_v23, %v3103_v28 }
0x15e1   :  { %v3112_v15 = vsel %vm3079_vm8, %v3110_v13, -inf  ;;  %v3111_v19 = vadd.f32 %v3109_v11, %v3105_v14  ;;  %3107 = vst.msk [vmem:[%s4625_s16 + $0x8] sm:$0xff] %vm3079_vm8, %v3105_v14 }
0x15e2   :  { %3113 = vmax.xlane.f32.xlu0 %v3112_v15 }
0x15e3   :  { %v3115_v51 = vsel %vm3079_vm8, %v3111_v19, -inf }
0x15e4   :  { %3116 = vmax.xlane.f32.xlu1 %v3115_v51 }
0x166f   :  { %v3114_v52 = vpop.xlane.xlu0 %3113 }
0x1670   :  { %vm3118_vm9 = vcmp.ge.f32.partialorder %v3110_v13, %v3114_v52 }
0x1671   :  { %v3120_v59 = vsel %vm3118_vm9, %v3866_v46, 4294967295  ;;  %v3117_v4 = vpop.xlane.xlu1 %3116 }
0x1672   :  { %v3122_v44 = vsel %vm3079_vm8, %v3120_v59, 2147483648  ;;  %vm3119_vm10 = vcmp.ge.f32.partialorder %v3111_v19, %v3117_v4 }
0x1673   :  { %v3121_v20 = vsel %vm3119_vm10, %v3866_v46, 4294967295  ;;  %v3124_v21 = vshra.s32 %v3122_v44, 16  ;;  %v3123_v57 = vand.u32 65535, %v3122_v44 }
0x1674   :  { %v3137_v40 = vsel %vm3079_vm8, %v3121_v20, 2147483648 }
0x1675   :  { %v3126_v16 = vcvt.s32.f32 %v3124_v21  ;;  %v3139_v30 = vshra.s32 %v3137_v40, 16  ;;  %v3138_v58 = vand.u32 65535, %v3137_v40  ;;  %v3125_v61 = vcvt.s32.f32 %v3123_v57 }
0x1677   :  { %3127 = vmax.xlane.f32.xlu0 %v3126_v16  ;;  %v3141_v18 = vcvt.s32.f32 %v3139_v30  ;;  %v3140_v1 = vcvt.s32.f32 %v3138_v58 }
0x1679   :  { %3142 = vmax.xlane.f32.xlu1 %v3141_v18 }
0x1704   :  { %v3128_v31 = vpop.xlane.xlu0 %3127 }
0x1705   :  { %vm3129_vm11 = vcmp.eq.f32.partialorder %v3126_v16, %v3128_v31  ;;  %v3134_v46 = vcvt.f32.s32 %v3128_v31 }
0x1706   :  { %v3143_v54 = vpop.xlane.xlu1 %3142  ;;  %v3130_v62 = vsel %vm3129_vm11, %v3125_v61, -inf }
0x1707   :  { %3131 = vmax.xlane.f32.xlu0 %v3130_v62  ;;  %vm3144_vm12 = vcmp.eq.f32.partialorder %v3141_v18, %v3143_v54  ;;  %v3149_v56 = vcvt.f32.s32 %v3143_v54  ;;  %v3135_v9 = vshll.u32 %v3134_v46, 16 }
0x1708   :  { %v3145_v3 = vsel %vm3144_vm12, %v3140_v1, -inf }
0x1709   :  { %3146 = vmax.xlane.f32.xlu1 %v3145_v3  ;;  %v3150_v45 = vshll.u32 %v3149_v56, 16 }
0x1794   :  { %v3132_v47 = vpop.xlane.xlu0 %3131 }
0x1795   :  { %v3133_v5 = vcvt.f32.s32 %v3132_v47 }
0x1796   :  { %v3147_v6 = vpop.xlane.xlu1 %3146 }
0x1797   :  { %v3136_v37 = vadd.s32 %v3135_v9, %v3133_v5  ;;  %v3148_v49 = vcvt.f32.s32 %v3147_v6 }
0x1799   :  { %3153 = vst.msk [vmem:[%s4626_s17] sm:$0xff] %vm3152_vm13, %v3136_v37  ;;  %v3151_v7 = vadd.s32 %v3150_v45, %v3148_v49 }
0x179b   :  { %3154 = vst.msk [vmem:[%s4626_s17 + $0x8] sm:$0xff] %vm3152_vm13, %v3151_v7 }

</bundles_post_ra>
